<compile_context>
chip_gen: v7x
topology: tpu7x:2x2x1
jax: 0.10.0
libtpu: 0.0.40
codegen_flags: <defaults>
</compile_context>

<pallas_src>
import jax
import jax.numpy as jnp
from jax.experimental import pallas as pl
from jax.experimental.pallas import tpu as pltpu

NF_PRIMITIVES = ["none", "identity", "sum", "mult", "cat_lin"]
NUM_OPS = len(NF_PRIMITIVES)


def _nf_mixed_kernel(coeff_ref, sub_ref, obj_ref, subn_ref, objn_ref,
                     w1_ref, w2_ref, b_ref, out_sub_ref, out_obj_ref):
    # Pre-combined scalar mixing coefficients (SMEM):
    #   c_emb = w_identity + w_sum, c_node = w_sum, c_mul = w_mult, c_lin = w_cat_lin
    # ('none' contributes zero.)
    c_emb = coeff_ref[0]
    c_node = coeff_ref[1]
    c_mul = coeff_ref[2]
    c_lin = coeff_ref[3]

    tm = out_sub_ref.shape[0]

    # Stack sub/obj along rows: one (2*tm, H) GEMM per weight half (bigger MXU M,
    # half the matmul issue overhead vs. four small dots).
    x = jnp.concatenate([sub_ref[...], obj_ref[...]], axis=0)     # (2*tm, Hp)
    nd = jnp.concatenate([subn_ref[...], objn_ref[...]], axis=0)  # (2*tm, Hp)

    # concat([x, nd], -1) @ W^T + b  ==  x @ W1 + nd @ W2 + b.
    # Feed the native dtype straight to the MXU, accumulate in f32.
    lin = jnp.maximum(
        jnp.dot(x, w1_ref[...], preferred_element_type=jnp.float32)
        + jnp.dot(nd, w2_ref[...], preferred_element_type=jnp.float32)
        + b_ref[...].astype(jnp.float32),
        0.0)

    # Elementwise mix in f32 (no-op cast for f32 inputs; keeps v5e off the
    # bf16-VALU emulation path for bf16 inputs).
    xf = x.astype(jnp.float32)
    nf = nd.astype(jnp.float32)
    mixed = c_emb * xf + c_node * nf + c_mul * (xf * nf) + c_lin * lin

    out_sub_ref[...] = mixed[:tm].astype(out_sub_ref.dtype)
    out_obj_ref[...] = mixed[tm:].astype(out_obj_ref.dtype)


def _pad_to(x, rows, cols):
    r, c = x.shape
    if r == rows and c == cols:
        return x
    return jnp.pad(x, ((0, rows - r), (0, cols - c)))


def nf_mixed_op(sub_emb, obj_emb, sub_node, obj_node, weights, lin_wt, lin_b,
                *, tile_rows=None, vmem_limit_bytes=None):
    """weights: (NUM_OPS,) softmax weights; lin_wt: (2H, H) (pre-transposed); lin_b: (1, H).

    tile_rows: rows per grid step (tuning knob). If None, auto-sized so that the
    six double-buffered streamed tiles fit a conservative VMEM budget that is
    safe on v5e/v6e/v7x default scoped VMEM. For large H raise tile_rows and
    pass vmem_limit_bytes explicitly.
    """
    n, h = sub_emb.shape
    assert lin_wt.shape == (2 * h, h), "lin_wt must be (2H, H) (transposed layout)"

    dtype = sub_emb.dtype
    itemsize = jnp.dtype(dtype).itemsize

    # Lane-dense layout: pad the hidden dim to a multiple of 128 lanes so output
    # stores are unmasked full-vreg vst's. Zero padding is exact (padded weight
    # rows/cols are zero, padded lanes are sliced off).
    hp = max(128, pl.cdiv(h, 128) * 128)
    n8 = pl.cdiv(n, 8) * 8

    if tile_rows is None:
        # 4 input + 2 output streamed tiles, double-buffered each.
        budget = 12 << 20  # conservative: fits default scoped VMEM on all gens
        per_row_bytes = 6 * 2 * hp * itemsize
        t = (budget // per_row_bytes) // 8 * 8
        tile_rows = int(max(8, min(1024, n8, t)))
    else:
        tile_rows = int(max(8, pl.cdiv(tile_rows, 8) * 8))
        tile_rows = min(tile_rows, max(8, n8))

    np_ = pl.cdiv(n, tile_rows) * tile_rows  # padded row count
    grid = (np_ // tile_rows,)

    # Pre-combine mixing coefficients (removes one add + one mul per element).
    w = weights.astype(jnp.float32)
    coeffs = jnp.stack([w[1] + w[2], w[2], w[3], w[4]])  # (4,)

    # Split the Linear weight into the two H x H halves host-side (no per-step
    # in-kernel slicing / casting of the full (2H, H) block).
    w1 = _pad_to(lin_wt[:h, :], hp, hp)
    w2 = _pad_to(lin_wt[h:, :], hp, hp)
    bias = _pad_to(lin_b, 1, hp)

    sub_p = _pad_to(sub_emb, np_, hp)
    obj_p = _pad_to(obj_emb, np_, hp)
    subn_p = _pad_to(sub_node, np_, hp)
    objn_p = _pad_to(obj_node, np_, hp)

    emb_spec = pl.BlockSpec((tile_rows, hp), lambda i: (i, 0))
    wt_spec = pl.BlockSpec((hp, hp), lambda i: (0, 0))      # constant -> DMA'd once
    bias_spec = pl.BlockSpec((1, hp), lambda i: (0, 0))

    wt_itemsize = jnp.dtype(lin_wt.dtype).itemsize
    cost = pl.CostEstimate(
        flops=int(8 * np_ * hp * hp + 16 * np_ * hp),
        transcendentals=0,
        bytes_accessed=int(6 * np_ * hp * itemsize
                           + 2 * hp * hp * wt_itemsize + hp * 4),
    )

    out_sub, out_obj = pl.pallas_call(
        _nf_mixed_kernel,
        out_shape=(jax.ShapeDtypeStruct((np_, hp), sub_emb.dtype),
                   jax.ShapeDtypeStruct((np_, hp), obj_emb.dtype)),
        grid_spec=pl.GridSpec(
            grid=grid,
            in_specs=[
                pl.BlockSpec(memory_space=pltpu.SMEM),   # coeffs (4,)
                emb_spec, emb_spec, emb_spec, emb_spec,  # sub, obj, subN, objN
                wt_spec, wt_spec, bias_spec,             # W1, W2, bias
            ],
            out_specs=(emb_spec, emb_spec),
        ),
        compiler_params=pltpu.CompilerParams(
            dimension_semantics=("parallel",),
            vmem_limit_bytes=vmem_limit_bytes),
        cost_estimate=cost,
    )(coeffs, sub_p, obj_p, subn_p, objn_p, w1, w2, bias)

    return out_sub[:n, :h], out_obj[:n, :h]


def _reference(sub, obj, subn, objn, weights, lin_wt, lin_b):
    # pure-JAX reference mirroring the PyTorch loop-over-ops semantics
    def cat_lin(x, nd):
        return jax.nn.relu(jnp.concatenate([x, nd], axis=-1) @ lin_wt + lin_b)
    ops = [
        (jnp.zeros_like(sub), jnp.zeros_like(obj)),          # none
        (sub, obj),                                          # identity
        (sub + subn, obj + objn),                            # sum
        (sub * subn, obj * objn),                            # mult
        (cat_lin(sub, subn), cat_lin(obj, objn)),            # cat_lin
    ]
    mixed_sub = sum(w * s for w, (s, _) in zip(weights, ops))
    mixed_obj = sum(w * o for w, (_, o) in zip(weights, ops))
    return mixed_sub, mixed_obj


def _run_case(key, n, h, tile_rows=None):
    ks = jax.random.split(key, 7)
    sub_emb = jax.random.normal(ks[0], (n, h), jnp.float32)
    obj_emb = jax.random.normal(ks[1], (n, h), jnp.float32)
    sub_node = jax.random.normal(ks[2], (n, h), jnp.float32)
    obj_node = jax.random.normal(ks[3], (n, h), jnp.float32)

    # architecture weights (softmax over NF_PRIMITIVES, as DARTS does)
    weights = jax.nn.softmax(jax.random.normal(ks[4], (NUM_OPS,), jnp.float32))

    # Linear(2H -> H) parameters, stored transposed as (2H, H)
    lin_wt = 0.1 * jax.random.normal(ks[5], (2 * h, h), jnp.float32)
    lin_b = 0.1 * jax.random.normal(ks[6], (1, h), jnp.float32)

    out_sub, out_obj = nf_mixed_op(sub_emb, obj_emb, sub_node, obj_node,
                                   weights, lin_wt, lin_b, tile_rows=tile_rows)
    jax.block_until_ready((out_sub, out_obj))

    ref_sub, ref_obj = _reference(sub_emb, obj_emb, sub_node, obj_node,
                                  weights, lin_wt, lin_b)
    assert jnp.allclose(out_sub, ref_sub, atol=1e-4, rtol=1e-4), \
        f"sub mismatch (n={n}, h={h})"
    assert jnp.allclose(out_obj, ref_obj, atol=1e-4, rtol=1e-4), \
        f"obj mismatch (n={n}, h={h})"


if __name__ == "__main__":
    key = jax.random.PRNGKey(0)
    # lane-dense case: H multiple of 128, auto tile covers all rows in one step
    _run_case(jax.random.fold_in(key, 0), n=256, h=128)
    # padding path: H < 128 and N not a multiple of 8 (pads to 128 lanes / 16 rows)
    _run_case(jax.random.fold_in(key, 1), n=10, h=32)
    print("KERNEL_OK")
</pallas_src>

<mosaic_0001>
module attributes {stable_mosaic.version = 11 : i64} {
  func.func @_nf_mixed_kernel(%arg0: i32, %arg1: memref<4xf32, #tpu.memory_space<smem>>, %arg2: memref<256x128xf32, #tpu.memory_space<vmem>>, %arg3: memref<256x128xf32, #tpu.memory_space<vmem>>, %arg4: memref<256x128xf32, #tpu.memory_space<vmem>>, %arg5: memref<256x128xf32, #tpu.memory_space<vmem>>, %arg6: memref<128x128xf32, #tpu.memory_space<vmem>>, %arg7: memref<128x128xf32, #tpu.memory_space<vmem>>, %arg8: memref<1x128xf32, #tpu.memory_space<vmem>>, %arg9: memref<256x128xf32, #tpu.memory_space<vmem>>, %arg10: memref<256x128xf32, #tpu.memory_space<vmem>>) attributes {dimension_semantics = [#tpu.dimension_semantics<parallel>], iteration_bounds = array<i64: 1>, scalar_prefetch = 0 : i64, scratch_operands = 0 : i64, tpu.core_type = #tpu.core_type<tc>, window_params = [{transform_indices = @transform_0, window_bounds = array<i64: 4>}, {transform_indices = @transform_1, window_bounds = array<i64: 256, 128>}, {transform_indices = @transform_2, window_bounds = array<i64: 256, 128>}, {transform_indices = @transform_3, window_bounds = array<i64: 256, 128>}, {transform_indices = @transform_4, window_bounds = array<i64: 256, 128>}, {pipeline_mode = #tpu.pipeline_mode<synchronous>, transform_indices = @transform_5, window_bounds = array<i64: 128, 128>}, {pipeline_mode = #tpu.pipeline_mode<synchronous>, transform_indices = @transform_6, window_bounds = array<i64: 128, 128>}, {pipeline_mode = #tpu.pipeline_mode<synchronous>, transform_indices = @transform_7, window_bounds = array<i64: 1, 128>}, {transform_indices = @transform_8, window_bounds = array<i64: 256, 128>}, {transform_indices = @transform_9, window_bounds = array<i64: 256, 128>}]} {
    %c0 = arith.constant 0 : index
    %0 = memref.load %arg1[%c0] : memref<4xf32, #tpu.memory_space<smem>>
    %c1 = arith.constant 1 : index
    %1 = memref.load %arg1[%c1] : memref<4xf32, #tpu.memory_space<smem>>
    %c2 = arith.constant 2 : index
    %2 = memref.load %arg1[%c2] : memref<4xf32, #tpu.memory_space<smem>>
    %c3 = arith.constant 3 : index
    %3 = memref.load %arg1[%c3] : memref<4xf32, #tpu.memory_space<smem>>
    %c0_0 = arith.constant 0 : index
    %c0_1 = arith.constant 0 : index
    %4 = vector.load %arg2[%c0_0, %c0_1] : memref<256x128xf32, #tpu.memory_space<vmem>>, vector<256x128xf32>
    %c0_2 = arith.constant 0 : index
    %c0_3 = arith.constant 0 : index
    %5 = vector.load %arg3[%c0_2, %c0_3] : memref<256x128xf32, #tpu.memory_space<vmem>>, vector<256x128xf32>
    %6 = tpu.concatenate %4, %5 in 0 : vector<256x128xf32>, vector<256x128xf32> -> vector<512x128xf32>
    %c0_4 = arith.constant 0 : index
    %c0_5 = arith.constant 0 : index
    %7 = vector.load %arg4[%c0_4, %c0_5] : memref<256x128xf32, #tpu.memory_space<vmem>>, vector<256x128xf32>
    %c0_6 = arith.constant 0 : index
    %c0_7 = arith.constant 0 : index
    %8 = vector.load %arg5[%c0_6, %c0_7] : memref<256x128xf32, #tpu.memory_space<vmem>>, vector<256x128xf32>
    %9 = tpu.concatenate %7, %8 in 0 : vector<256x128xf32>, vector<256x128xf32> -> vector<512x128xf32>
    %c0_8 = arith.constant 0 : index
    %c0_9 = arith.constant 0 : index
    %10 = vector.load %arg6[%c0_8, %c0_9] : memref<128x128xf32, #tpu.memory_space<vmem>>, vector<128x128xf32>
    %cst = arith.constant dense<0.000000e+00> : vector<512x128xf32>
    %11 = tpu.matmul %6, %10, %cst {dimension_numbers = #tpu.dot_dimension_numbers<[1], [0], [0], [1], [0, 0, 1, 1], [], []>} : vector<512x128xf32>, vector<128x128xf32>, vector<512x128xf32> -> vector<512x128xf32>
    %c0_10 = arith.constant 0 : index
    %c0_11 = arith.constant 0 : index
    %12 = vector.load %arg7[%c0_10, %c0_11] : memref<128x128xf32, #tpu.memory_space<vmem>>, vector<128x128xf32>
    %cst_12 = arith.constant dense<0.000000e+00> : vector<512x128xf32>
    %13 = tpu.matmul %9, %12, %cst_12 {dimension_numbers = #tpu.dot_dimension_numbers<[1], [0], [0], [1], [0, 0, 1, 1], [], []>} : vector<512x128xf32>, vector<128x128xf32>, vector<512x128xf32> -> vector<512x128xf32>
    %14 = arith.addf %11, %13 : vector<512x128xf32>
    %c0_13 = arith.constant 0 : index
    %c0_14 = arith.constant 0 : index
    %15 = vector.load %arg8[%c0_13, %c0_14] : memref<1x128xf32, #tpu.memory_space<vmem>>, vector<1x128xf32>
    %16 = vector.broadcast %15 : vector<1x128xf32> to vector<512x128xf32>
    %17 = arith.addf %14, %16 : vector<512x128xf32>
    %cst_15 = arith.constant 0.000000e+00 : f32
    %18 = vector.broadcast %cst_15 : f32 to vector<512x128xf32>
    %19 = arith.maximumf %17, %18 : vector<512x128xf32>
    %20 = vector.broadcast %0 : f32 to vector<512x128xf32>
    %21 = arith.mulf %20, %6 : vector<512x128xf32>
    %22 = vector.broadcast %1 : f32 to vector<512x128xf32>
    %23 = arith.mulf %22, %9 : vector<512x128xf32>
    %24 = arith.addf %21, %23 : vector<512x128xf32>
    %25 = arith.mulf %6, %9 : vector<512x128xf32>
    %26 = vector.broadcast %2 : f32 to vector<512x128xf32>
    %27 = arith.mulf %26, %25 : vector<512x128xf32>
    %28 = arith.addf %24, %27 : vector<512x128xf32>
    %29 = vector.broadcast %3 : f32 to vector<512x128xf32>
    %30 = arith.mulf %29, %19 : vector<512x128xf32>
    %31 = arith.addf %28, %30 : vector<512x128xf32>
    %32 = vector.extract_strided_slice %31 {offsets = [0, 0], sizes = [256, 128], strides = [1, 1]} : vector<512x128xf32> to vector<256x128xf32>
    %c0_16 = arith.constant 0 : index
    %c0_17 = arith.constant 0 : index
    %33 = vector.load %arg9[%c0_16, %c0_17] : memref<256x128xf32, #tpu.memory_space<vmem>>, vector<256x128xf32>
    tpu.vector_store %arg9[%c0_16, %c0_17], %32 {strides = array<i32>} : memref<256x128xf32, #tpu.memory_space<vmem>>, vector<256x128xf32>,
    %34 = vector.extract_strided_slice %31 {offsets = [256, 0], sizes = [256, 128], strides = [1, 1]} : vector<512x128xf32> to vector<256x128xf32>
    %c0_18 = arith.constant 0 : index
    %c0_19 = arith.constant 0 : index
    %35 = vector.load %arg10[%c0_18, %c0_19] : memref<256x128xf32, #tpu.memory_space<vmem>>, vector<256x128xf32>
    tpu.vector_store %arg10[%c0_18, %c0_19], %34 {strides = array<i32>} : memref<256x128xf32, #tpu.memory_space<vmem>>, vector<256x128xf32>,
    return
  }
  func.func @transform_0(%arg0: i32) -> i32 {
    %c0_i32 = arith.constant 0 : i32
    %c0_i32_0 = arith.constant 0 : i32
    return %c0_i32 : i32
  }
  func.func @transform_1(%arg0: i32) -> (i32, i32) {
    %c0_i32 = arith.constant 0 : i32
    %c0_i32_0 = arith.constant 0 : i32
    return %arg0, %c0_i32 : i32, i32
  }
  func.func @transform_2(%arg0: i32) -> (i32, i32) {
    %c0_i32 = arith.constant 0 : i32
    %c0_i32_0 = arith.constant 0 : i32
    return %arg0, %c0_i32 : i32, i32
  }
  func.func @transform_3(%arg0: i32) -> (i32, i32) {
    %c0_i32 = arith.constant 0 : i32
    %c0_i32_0 = arith.constant 0 : i32
    return %arg0, %c0_i32 : i32, i32
  }
  func.func @transform_4(%arg0: i32) -> (i32, i32) {
    %c0_i32 = arith.constant 0 : i32
    %c0_i32_0 = arith.constant 0 : i32
    return %arg0, %c0_i32 : i32, i32
  }
  func.func @transform_5(%arg0: i32) -> (i32, i32) {
    %c0_i32 = arith.constant 0 : i32
    %c0_i32_0 = arith.constant 0 : i32
    %c0_i32_1 = arith.constant 0 : i32
    return %c0_i32, %c0_i32_0 : i32, i32
  }
  func.func @transform_6(%arg0: i32) -> (i32, i32) {
    %c0_i32 = arith.constant 0 : i32
    %c0_i32_0 = arith.constant 0 : i32
    %c0_i32_1 = arith.constant 0 : i32
    return %c0_i32, %c0_i32_0 : i32, i32
  }
  func.func @transform_7(%arg0: i32) -> (i32, i32) {
    %c0_i32 = arith.constant 0 : i32
    %c0_i32_0 = arith.constant 0 : i32
    %c0_i32_1 = arith.constant 0 : i32
    return %c0_i32, %c0_i32_0 : i32, i32
  }
  func.func @transform_8(%arg0: i32) -> (i32, i32) {
    %c0_i32 = arith.constant 0 : i32
    %c0_i32_0 = arith.constant 0 : i32
    return %arg0, %c0_i32 : i32, i32
  }
  func.func @transform_9(%arg0: i32) -> (i32, i32) {
    %c0_i32 = arith.constant 0 : i32
    %c0_i32_0 = arith.constant 0 : i32
    return %arg0, %c0_i32 : i32, i32
  }
}

</mosaic_0001>

<bundles_post_ra>
// kernel: tpu_custom_call.1
= control target key start
LH: loop header
LB: loop body
LE: loop exit
PB: predicated region body
PF: predicated region fallthrough
CT: control target
= control target key end

     0   :  { %15 = vsyncpa [#allocation5], 0  ;;  %s3964_s0 = inlined_call_operand.hbm [shape: f32[4], index: 0, kind: input, shape index: {}]   ;;  %s3965_s1 = inlined_call_operand.hbm [shape: f32[256,128], index: 1, kind: input, shape index: {}]   ;;  %s3966_s2 = inlined_call_operand.hbm [shape: f32[256,128], index: 2, kind: input, shape index: {}]   ;;  %s3967_s3 = inlined_call_operand.hbm [shape: f32[256,128], index: 3, kind: input, shape index: {}]   ;;  %s3968_s4 = inlined_call_operand.hbm [shape: f32[256,128], index: 4, kind: input, shape index: {}]   ;;  %s3969_s5 = inlined_call_operand.hbm [shape: f32[128,128], index: 5, kind: input, shape index: {}]   ;;  %s3970_s6 = inlined_call_operand.hbm [shape: f32[128,128], index: 6, kind: input, shape index: {}]   ;;  %s3971_s7 = inlined_call_operand.vmem [shape: f32[1,128], index: 7, kind: input, shape index: {}]   ;;  %s3972_s8 = inlined_call_operand.hbm [shape: f32[256,128], index: 8, kind: output, shape index: {0}]   ;;  %s3973_s9 = inlined_call_operand.hbm [shape: f32[256,128], index: 9, kind: output, shape index: {1}]  }
   0x1   :  { %16 = vsyncpa [#allocation3], 0 }
   0x2   :  { %17 = vsyncpa [#allocation8], 0 }
   0x3   :  { %18 = vsyncpa [#allocation11], 0 }
   0x4   :  { %19 = vsyncpa [#allocation14], 0 }
   0x5   :  { %20 = vsyncpa [#allocation4], 0 }
   0x6   :  { %21 = vsyncpa [#allocation17], 0  ;;  %s2571_s30 = smov [#allocation7]   ;;  %s2572_s11 = smov [#allocation10]  }
   0x7   :  { %s47_s10 = sshll.u32 %s2571_s30, 4  ;;  %s71_s12 = sshll.u32 %s2572_s11, 4  ;;  %s48_s10 = int_to_ptr.vmem [resolvable:$true] %s47_s10  ;;  %s2632_s12 = int_to_ptr.vmem [resolvable:$true] %s71_s12 }
   0x8   :  { %s2371_s15 = scalar_lea.hbm %s3966_s2, 4096 }
   0x9   :  { %p2372_p0 = scmp.ne.s32.totalorder %s3966_s2, %s2371_s15  ;;  %p2375_p1 = scmp.lt.u32.totalorder %s2371_s15, %s3966_s2 }
   0xb   :  { %p2377_p2 = pnand %p2375_p1, %p2372_p0 }
   0xd   :  { %2380 = shalt.err (!%p2377_p2)
}
   0xe   :  { %s2381_s20 = scalar_lea.vmem %s48_s10, 4096  ;;  %p2386_p4 = scmp.lt.s32.totalorder %s48_s10, %s48_s10 }
   0xf   :  { %p2382_p3 = scmp.ne.s32.totalorder %s48_s10, %s2381_s20  ;;  %p2387_p5 = scmp.lt.s32.totalorder %s2381_s20, %s2381_s20 }
  0x11   :  { %p2388_p6 = por %p2387_p5, %p2386_p4 }
  0x13   :  { %p2389_p7 = pnand %p2388_p6, %p2382_p3 }
  0x15   :  { %2392 = shalt.err (!%p2389_p7)
}
  0x16   :  { %s2573_s21 = smov 128   ;;  %s2574_s22 = smov 8  }
  0x17   :  { %53 = dma.hbm_to_vmem [thread:$0]  %s3966_s2, 4096, %s48_s10, [#allocation8], %s2573_s21, %s2573_s21, %s2574_s22  }
  0x18   :  { %s2393_s27 = scalar_lea.hbm %s3968_s4, 4096 }
  0x19   :  { %p2394_p8 = scmp.ne.s32.totalorder %s3968_s4, %s2393_s27  ;;  %p2397_p9 = scmp.lt.u32.totalorder %s2393_s27, %s3968_s4 }
  0x1b   :  { %p2399_p10 = pnand %p2397_p9, %p2394_p8 }
  0x1d   :  { %2402 = shalt.err (!%p2399_p10)
}
  0x1e   :  { %s2403_s13 = scalar_lea.vmem %s2632_s12, 4096  ;;  %p2408_p12 = scmp.lt.s32.totalorder %s2632_s12, %s2632_s12 }
  0x1f   :  { %p2404_p11 = scmp.ne.s32.totalorder %s2632_s12, %s2403_s13  ;;  %p2409_p13 = scmp.lt.s32.totalorder %s2403_s13, %s2403_s13 }
  0x21   :  { %p2410_p0 = por %p2409_p13, %p2408_p12 }
  0x23   :  { %p2411_p1 = pnand %p2410_p0, %p2404_p11 }
  0x25   :  { %2414 = shalt.err (!%p2411_p1)
}
  0x26   :  { %77 = dma.hbm_to_vmem [thread:$0]  %s3968_s4, 4096, %s2632_s12, [#allocation11], %s2573_s21, %s2573_s21, %s2574_s22  }
  0x27   :  { %s2415_s16 = scalar_lea.hbm %s3964_s0, 16 }
  0x28   :  { %p2416_p2 = scmp.ne.s32.totalorder %s3964_s0, %s2415_s16  ;;  %p2419_p3 = scmp.lt.u32.totalorder %s2415_s16, %s3964_s0 }
  0x2a   :  { %p2421_p4 = pnand %p2419_p3, %p2416_p2 }
  0x2c   :  { %2424 = shalt.err (!%p2421_p4)
}
  0x2d   :  { %s2575_s23 = smov [#allocation2]   ;;  %s2576_s4 = smov [#allocation6]  }
  0x2e   :  { %29 = dma.hbm_to_smem %s3964_s0, 16, %s2575_s23, [#allocation5]  }
  0x2f   :  { %s35_s12 = sshll.u32 %s2576_s4, 4  ;;  %s2577_s26 = smov [#allocation9]   ;;  %s36_s12 = int_to_ptr.vmem [resolvable:$true] %s35_s12 }
  0x30   :  { %s59_s27 = sshll.u32 %s2577_s26, 4  ;;  %s2425_s30 = scalar_lea.hbm %s3965_s1, 4096  ;;  %s60_s27 = int_to_ptr.vmem [resolvable:$true] %s59_s27 }
  0x31   :  { %p2426_p5 = scmp.ne.s32.totalorder %s3965_s1, %s2425_s30  ;;  %p2429_p6 = scmp.lt.u32.totalorder %s2425_s30, %s3965_s1 }
  0x33   :  { %p2431_p7 = pnand %p2429_p6, %p2426_p5 }
  0x35   :  { %2434 = shalt.err (!%p2431_p7)
}
  0x36   :  { %s2435_s0 = scalar_lea.vmem %s36_s12, 4096  ;;  %p2440_p9 = scmp.lt.s32.totalorder %s36_s12, %s36_s12 }
  0x37   :  { %p2436_p8 = scmp.ne.s32.totalorder %s36_s12, %s2435_s0  ;;  %p2441_p10 = scmp.lt.s32.totalorder %s2435_s0, %s2435_s0 }
  0x39   :  { %p2442_p11 = por %p2441_p10, %p2440_p9 }
  0x3b   :  { %p2443_p12 = pnand %p2442_p11, %p2436_p8 }
  0x3d   :  { %2446 = shalt.err (!%p2443_p12)
}
  0x3e   :  { %41 = dma.hbm_to_vmem [thread:$0]  %s3965_s1, 4096, %s36_s12, [#allocation3], %s2573_s21, %s2573_s21, %s2574_s22  }
  0x3f   :  { %s2447_s18 = scalar_lea.hbm %s3967_s3, 4096 }
  0x40   :  { %p2448_p13 = scmp.ne.s32.totalorder %s3967_s3, %s2447_s18  ;;  %p2451_p0 = scmp.lt.u32.totalorder %s2447_s18, %s3967_s3 }
  0x42   :  { %p2453_p1 = pnand %p2451_p0, %p2448_p13 }
  0x44   :  { %2456 = shalt.err (!%p2453_p1)
}
  0x45   :  { %s2457_s25 = scalar_lea.vmem %s60_s27, 4096  ;;  %p2462_p3 = scmp.lt.s32.totalorder %s60_s27, %s60_s27 }
  0x46   :  { %p2458_p2 = scmp.ne.s32.totalorder %s60_s27, %s2457_s25  ;;  %p2463_p4 = scmp.lt.s32.totalorder %s2457_s25, %s2457_s25 }
  0x48   :  { %p2464_p5 = por %p2463_p4, %p2462_p3 }
  0x4a   :  { %p2465_p6 = pnand %p2464_p5, %p2458_p2 }
  0x4c   :  { %2468 = shalt.err (!%p2465_p6)
}
  0x4d   :  { %65 = dma.hbm_to_vmem [thread:$0]  %s3967_s3, 4096, %s60_s27, [#allocation8], %s2573_s21, %s2573_s21, %s2574_s22  }
  0x4e   :  { %s2578_s12 = smov [#allocation12]   ;;  %s2579_s28 = smov [#allocation13]  }
  0x4f   :  { %s83_s26 = sshll.u32 %s2578_s12, 4  ;;  %s95_s29 = sshll.u32 %s2579_s28, 4  ;;  %s84_s26 = int_to_ptr.vmem [resolvable:$true] %s83_s26  ;;  %s96_s29 = int_to_ptr.vmem [resolvable:$true] %s95_s29 }
  0x50   :  { %s2469_s13 = scalar_lea.hbm %s3969_s5, 2048 }
  0x51   :  { %p2470_p7 = scmp.ne.s32.totalorder %s3969_s5, %s2469_s13  ;;  %p2473_p8 = scmp.lt.u32.totalorder %s2469_s13, %s3969_s5 }
  0x53   :  { %p2475_p9 = pnand %p2473_p8, %p2470_p7 }
  0x55   :  { %2478 = shalt.err (!%p2475_p9)
}
  0x56   :  { %s2479_s3 = scalar_lea.vmem %s84_s26, 2048  ;;  %p2484_p11 = scmp.lt.s32.totalorder %s84_s26, %s84_s26 }
  0x57   :  { %p2480_p10 = scmp.ne.s32.totalorder %s84_s26, %s2479_s3  ;;  %p2485_p12 = scmp.lt.s32.totalorder %s2479_s3, %s2479_s3 }
  0x59   :  { %p2486_p13 = por %p2485_p12, %p2484_p11 }
  0x5b   :  { %p2487_p0 = pnand %p2486_p13, %p2480_p10 }
  0x5d   :  { %2490 = shalt.err (!%p2487_p0)
}
  0x5e   :  { %89 = dma.hbm_to_vmem [thread:$0]  %s3969_s5, 2048, %s84_s26, [#allocation11], %s2573_s21, %s2573_s21, %s2574_s22  }
  0x5f   :  { %s2491_s18 = scalar_lea.hbm %s3970_s6, 2048 }
  0x60   :  { %p2492_p1 = scmp.ne.s32.totalorder %s3970_s6, %s2491_s18  ;;  %p2495_p2 = scmp.lt.u32.totalorder %s2491_s18, %s3970_s6 }
  0x62   :  { %p2497_p3 = pnand %p2495_p2, %p2492_p1 }
  0x64   :  { %2500 = shalt.err (!%p2497_p3)
}
  0x65   :  { %s2501_s25 = scalar_lea.vmem %s96_s29, 2048  ;;  %p2506_p5 = scmp.lt.s32.totalorder %s96_s29, %s96_s29 }
  0x66   :  { %p2502_p4 = scmp.ne.s32.totalorder %s96_s29, %s2501_s25  ;;  %p2507_p6 = scmp.lt.s32.totalorder %s2501_s25, %s2501_s25 }
  0x68   :  { %p2508_p7 = por %p2507_p6, %p2506_p5 }
  0x6a   :  { %p2509_p8 = pnand %p2508_p7, %p2502_p4 }
  0x6c   :  { %2512 = shalt.err (!%p2509_p8)
}
  0x6d   :  { %101 = dma.hbm_to_vmem [thread:$0]  %s3970_s6, 2048, %s96_s29, [#allocation14], %s2573_s21, %s2573_s21, %s2574_s22  }
  0x6e   :  { %2557 = dma.done.wait [#allocation5], 16  }
  0x6f   :  { %2558 = vsyncadd [#allocation5], 4294967280 }
  0x70   :  { %2559 = dma.done.wait [#allocation3], 4096  }
  0x71   :  { %2560 = vsyncadd [#allocation3], 4294963200 }
  0x72   :  { %2561 = dma.done.wait [#allocation8], 8192  }
  0x73   :  { %2562 = vsyncadd [#allocation8], 4294959104 }
  0x74   :  { %2563 = dma.done.wait [#allocation11], 6144  }
  0x75   :  { %2564 = vsyncadd [#allocation11], 4294961152 }
  0x76   :  { %2565 = dma.done.wait [#allocation14], 2048  }
  0x77   :  { %2566 = vsyncadd [#allocation14], 4294965248 }
  0x78   :  { %125 = sfence }
  0x79   :  { %v274_v0 = vld [vmem:[#allocation13] sm:$0xff]  ;;  %v275_v1 = vld [vmem:[#allocation13 + $0x8] sm:$0xff]  ;;  %s2741_s4 = sld [smem:[#allocation2 + $0x1]]  ;;  %v276_v5 = vld [vmem:[#allocation13 + $0x10] sm:$0xff]  ;;  %s2743_s6 = sld [smem:[#allocation2]] }
  0x7a   :  { %v258_v2 = vld [vmem:[#allocation12] sm:$0xff]  ;;  %v2232_v3 = vpack.c.bf16 %v275_v1, %v274_v0  ;;  %v259_v4 = vld [vmem:[#allocation12 + $0x8] sm:$0xff]  ;;  %v277_v6 = vld [vmem:[#allocation13 + $0x18] sm:$0xff]  ;;  %s2745_s12 = sld [smem:[#allocation2 + $0x2]]  ;;  %s1814_s26 = sld [smem:[#allocation2 + $0x3]] }
  0x7b   :  { %v2264_v7 = vpack.c.bf16 %v259_v4, %v258_v2  ;;  %v2236_v8 = vpack.c.bf16 %v277_v6, %v276_v5  ;;  %v260_v9 = vld [vmem:[#allocation12 + $0x10] sm:$0xff]  ;;  %v261_v10 = vld [vmem:[#allocation12 + $0x18] sm:$0xff]  ;;  %v278_v11 = vld [vmem:[#allocation13 + $0x20] sm:$0xff] }
  0x7c   :  { %2233 = vmatprep.subr.bf16.mxu1 %v2232_v3  ;;  %v2268_v12 = vpack.c.bf16 %v261_v10, %v260_v9  ;;  %v279_v13 = vld [vmem:[#allocation13 + $0x28] sm:$0xff]  ;;  %v262_v14 = vld [vmem:[#allocation12 + $0x20] sm:$0xff]  ;;  %v280_v16 = vld [vmem:[#allocation13 + $0x30] sm:$0xff] }
  0x7d   :  { %v263_v15 = vld [vmem:[#allocation12 + $0x28] sm:$0xff]  ;;  %2265 = vmatprep.subr.bf16.mxu0 %v2264_v7  ;;  %2235 = vmatpush3.bf16.msra.mxu1 %v2232_v3  ;;  %v281_v17 = vld [vmem:[#allocation13 + $0x38] sm:$0xff]  ;;  %v264_v18 = vld [vmem:[#allocation12 + $0x30] sm:$0xff]  ;;  %v2240_v19 = vpack.c.bf16 %v279_v13, %v278_v11 }
  0x7e   :  { %2267 = vmatpush3.bf16.msra.mxu0 %v2264_v7  ;;  %2237 = vmatprep.subr.bf16.mxu1 %v2236_v8  ;;  %v265_v20 = vld [vmem:[#allocation12 + $0x38] sm:$0xff]  ;;  %v282_v21 = vld [vmem:[#allocation13 + $0x40] sm:$0xff]  ;;  %v283_v22 = vld [vmem:[#allocation13 + $0x48] sm:$0xff]  ;;  %v2272_v23 = vpack.c.bf16 %v263_v15, %v262_v14  ;;  %v2244_v30 = vpack.c.bf16 %v281_v17, %v280_v16 }
  0x7f   :  { %2269 = vmatprep.subr.bf16.mxu0 %v2268_v12  ;;  %v266_v24 = vld [vmem:[#allocation12 + $0x40] sm:$0xff]  ;;  %v267_v25 = vld [vmem:[#allocation12 + $0x48] sm:$0xff]  ;;  %v284_v26 = vld [vmem:[#allocation13 + $0x50] sm:$0xff]  ;;  %v2748_v34 = vstv %s2741_s4  ;;  %v2276_v35 = vpack.c.bf16 %v265_v20, %v264_v18  ;;  %v2750_v36 = vpack.c.bf16 %v283_v22, %v282_v21  ;;  %v2755_v41 = vstv %s2743_s6 }
  0x80   :  { %v285_v27 = vld [vmem:[#allocation13 + $0x58] sm:$0xff]  ;;  %v268_v28 = vld [vmem:[#allocation12 + $0x50] sm:$0xff]  ;;  %v286_v31 = vld [vmem:[#allocation13 + $0x60] sm:$0xff]  ;;  %v2752_v37 = vpack.c.bf16 %v267_v25, %v266_v24  ;;  %v2764_v48 = vstv %s2745_s12 }
  0x81   :  { %v269_v29 = vld [vmem:[#allocation12 + $0x58] sm:$0xff]  ;;  %2239 = vmatpush3.bf16.msra.mxu1 %v2236_v8  ;;  %v287_v32 = vld [vmem:[#allocation13 + $0x68] sm:$0xff]  ;;  %v270_v33 = vld [vmem:[#allocation12 + $0x60] sm:$0xff]  ;;  %v2757_v42 = vpack.c.bf16 %v285_v27, %v284_v26 }
  0x82   :  { %2271 = vmatpush3.bf16.msra.mxu0 %v2268_v12  ;;  %2241 = vmatprep.subr.bf16.mxu1 %v2240_v19  ;;  %v271_v38 = vld [vmem:[#allocation12 + $0x68] sm:$0xff]  ;;  %v288_v39 = vld [vmem:[#allocation13 + $0x70] sm:$0xff]  ;;  %v289_v40 = vld [vmem:[#allocation13 + $0x78] sm:$0xff]  ;;  %v2759_v43 = vpack.c.bf16 %v269_v29, %v268_v28  ;;  %v2761_v44 = vpack.c.bf16 %v287_v32, %v286_v31 }
  0x83   :  { %2273 = vmatprep.subr.bf16.mxu0 %v2272_v23  ;;  %v272_v45 = vld [vmem:[#allocation12 + $0x70] sm:$0xff]  ;;  %v273_v46 = vld [vmem:[#allocation12 + $0x78] sm:$0xff]  ;;  %v194_v47 = vld [vmem:[#allocation9] sm:$0xff]  ;;  %v2766_v49 = vpack.c.bf16 %v271_v38, %v270_v33  ;;  %v2768_v50 = vpack.c.bf16 %v289_v40, %v288_v39 }
  0x84   :  { %v2770_v51 = vpack.c.bf16 %v273_v46, %v272_v45  ;;  %2008 = vmatprep.mubr.f32.mxu1 %v194_v47  ;;  %v1261_v52 = vmul.f32 %v2748_v34, %v194_v47  ;;  %v130_v53 = vld [vmem:[#allocation6] sm:$0xff]  ;;  %v2773_v54 = vld [vmem:[#allocation9 + $0x8] sm:$0xff]  ;;  %v2780_v59 = vld [vmem:[#allocation9 + $0x10] sm:$0xff] }
  0x85   :  { %2243 = vmatpush3.bf16.msra.mxu1 %v2240_v19  ;;  %2136 = vmatprep.mubr.f32.mxu0 %v130_v53  ;;  %v1196_v55 = vmul.f32 %v2755_v41, %v130_v53  ;;  %v1389_v56 = vmul.f32 %v194_v47, %v130_v53  ;;  %v1262_v57 = vmul.f32 %v2748_v34, %v2773_v54  ;;  %v2778_v58 = vld [vmem:[#allocation6 + $0x8] sm:$0xff]  ;;  %v2788_v63 = vld [vmem:[#allocation6 + $0x10] sm:$0xff]  ;;  %v2795_v4 = vld [vmem:[#allocation9 + $0x18] sm:$0xff] }
  0x86   :  { %2275 = vmatpush3.bf16.msra.mxu0 %v2272_v23  ;;  %2245 = vmatprep.subr.bf16.mxu1 %v2244_v30  ;;  %v1197_v60 = vmul.f32 %v2755_v41, %v2778_v58  ;;  %v1390_v61 = vmul.f32 %v2773_v54, %v2778_v58  ;;  %v1263_v62 = vmul.f32 %v2748_v34, %v2780_v59  ;;  %v2797_v5 = vld [vmem:[#allocation6 + $0x18] sm:$0xff]  ;;  %v2809_v14 = vld [vmem:[#allocation9 + $0x20] sm:$0xff]  ;;  %v2826_v23 = vld [vmem:[#allocation9 + $0x28] sm:$0xff] }
  0x87   :  { %2277 = vmatprep.subr.bf16.mxu0 %v2276_v35  ;;  %v1325_v0 = vadd.f32 %v1261_v52, %v1196_v55  ;;  %v1454_v1 = vmul.f32 %v2764_v48, %v1389_v56  ;;  %v1198_v2 = vmul.f32 %v2755_v41, %v2788_v63  ;;  %v1391_v3 = vmul.f32 %v2780_v59, %v2788_v63  ;;  %v2816_v18 = vld [vmem:[#allocation6 + $0x20] sm:$0xff]  ;;  %v2828_v24 = vld [vmem:[#allocation6 + $0x28] sm:$0xff]  ;;  %v2830_v25 = vld [vmem:[#allocation9 + $0x30] sm:$0xff] }
  0x88   :  { %v1326_v6 = vadd.f32 %v1262_v57, %v1197_v60  ;;  %v1455_v7 = vmul.f32 %v2764_v48, %v1390_v61  ;;  %v1264_v8 = vmul.f32 %v2748_v34, %v2795_v4  ;;  %v1199_v9 = vmul.f32 %v2755_v41, %v2797_v5  ;;  %v2853_v45 = vld [vmem:[#allocation9 + $0x38] sm:$0xff]  ;;  %v2864_v53 = vld [vmem:[#allocation9 + $0x40] sm:$0xff] }
  0x89   :  { %2247 = vmatpush3.bf16.msra.mxu1 %v2244_v30  ;;  %v2804_v10 = vadd.f32 %v1454_v1, %v1325_v0  ;;  %v1327_v11 = vadd.f32 %v1263_v62, %v1198_v2  ;;  %v1456_v12 = vmul.f32 %v2764_v48, %v1391_v3  ;;  %v1392_v13 = vmul.f32 %v2795_v4, %v2797_v5  ;;  %v2840_v30 = vld [vmem:[#allocation6 + $0x30] sm:$0xff]  ;;  %v2873_v61 = vld [vmem:[#allocation6 + $0x40] sm:$0xff]  ;;  %v2875_v62 = vld [vmem:[#allocation9 + $0x48] sm:$0xff] }
  0x8a   :  { %2279 = vmatpush3.bf16.msra.mxu0 %v2276_v35  ;;  %2249 = vmatprep.subr.bf16.mxu1 %v2750_v36  ;;  %v2812_v15 = vadd.f32 %v1455_v7, %v1326_v6  ;;  %v1328_v16 = vadd.f32 %v1264_v8, %v1199_v9  ;;  %v1265_v17 = vmul.f32 %v2748_v34, %v2809_v14  ;;  %v2884_v6 = vld [vmem:[#allocation6 + $0x48] sm:$0xff]  ;;  %v2893_v9 = vld [vmem:[#allocation9 + $0x50] sm:$0xff] }
  0x8b   :  { %3978 = vst [vmem:[#allocation25_spill] sm:$0xff] %v2804_v10  ;;  %2281 = vmatprep.subr.bf16.mxu0 %v2752_v37  ;;  %v2819_v19 = vadd.f32 %v1456_v12, %v1327_v11  ;;  %v1457_v20 = vmul.f32 %v2764_v48, %v1392_v13  ;;  %v1200_v21 = vmul.f32 %v2755_v41, %v2816_v18 }
  0x8c   :  { %3979 = vst [vmem:[#allocation26_spill] sm:$0xff] %v2812_v15  ;;  %v1393_v22 = vmul.f32 %v2809_v14, %v2816_v18  ;;  %v1266_v26 = vmul.f32 %v2748_v34, %v2826_v23  ;;  %v1201_v27 = vmul.f32 %v2755_v41, %v2828_v24  ;;  %v1394_v28 = vmul.f32 %v2826_v23, %v2828_v24 }
  0x8d   :  { %3980 = vst [vmem:[#allocation27_spill] sm:$0xff] %v2819_v19  ;;  %v1267_v29 = vmul.f32 %v2748_v34, %v2830_v25  ;;  %2251 = vmatpush3.bf16.msra.mxu1 %v2750_v36  ;;  %v2843_v31 = vadd.f32 %v1457_v20, %v1328_v16  ;;  %v1329_v32 = vadd.f32 %v1265_v17, %v1200_v21  ;;  %v2855_v36 = vld [vmem:[#allocation6 + $0x38] sm:$0xff]  ;;  %v2901_v16 = vld [vmem:[#allocation6 + $0x50] sm:$0xff] }
  0x8e   :  { %v1458_v33 = vmul.f32 %v2764_v48, %v1393_v22  ;;  %v1202_v35 = vmul.f32 %v2755_v41, %v2840_v30  ;;  %2283 = vmatpush3.bf16.msra.mxu0 %v2752_v37  ;;  %2253 = vmatprep.subr.bf16.mxu1 %v2757_v42  ;;  %v1330_v38 = vadd.f32 %v1266_v26, %v1201_v27  ;;  %v2909_v26 = vld [vmem:[#allocation9 + $0x58] sm:$0xff] }
  0x8f   :  { %3981 = vst [vmem:[#allocation28_spill] sm:$0xff] %v2843_v31  ;;  %v1459_v39 = vmul.f32 %v2764_v48, %v1394_v28  ;;  %v1395_v40 = vmul.f32 %v2830_v25, %v2840_v30  ;;  %2285 = vmatprep.subr.bf16.mxu0 %v2759_v43  ;;  %v1268_v37 = vmul.f32 %v2748_v34, %v2853_v45  ;;  %v2911_v27 = vld [vmem:[#allocation6 + $0x58] sm:$0xff] }
  0x90   :  { %v2858_v46 = vadd.f32 %v1458_v33, %v1329_v32  ;;  %v1331_v47 = vadd.f32 %v1267_v29, %v1202_v35  ;;  %v1203_v52 = vmul.f32 %v2755_v41, %v2855_v36  ;;  %v1396_v57 = vmul.f32 %v2853_v45, %v2855_v36 }
  0x91   :  { %v2866_v55 = vadd.f32 %v1459_v39, %v1330_v38  ;;  %v1460_v56 = vmul.f32 %v2764_v48, %v1395_v40  ;;  %v1269_v60 = vmul.f32 %v2748_v34, %v2864_v53  ;;  %2255 = vmatpush3.bf16.msra.mxu1 %v2757_v42  ;;  %v1204_v1 = vmul.f32 %v2755_v41, %v2873_v61  ;;  %v2926_v39 = vld [vmem:[#allocation9 + $0x60] sm:$0xff] }
  0x92   :  { %3982 = vst [vmem:[#allocation29_spill] sm:$0xff] %v2858_v46  ;;  %v1332_v0 = vadd.f32 %v1268_v37, %v1203_v52  ;;  %v1397_v2 = vmul.f32 %v2864_v53, %v2873_v61  ;;  %v1270_v3 = vmul.f32 %v2748_v34, %v2875_v62  ;;  %2287 = vmatpush3.bf16.msra.mxu0 %v2759_v43  ;;  %v2928_v40 = vld [vmem:[#allocation6 + $0x60] sm:$0xff] }
  0x93   :  { %3983 = vst [vmem:[#allocation30_spill] sm:$0xff] %v2866_v55  ;;  %2257 = vmatprep.subr.bf16.mxu1 %v2761_v44  ;;  %v2888_v7 = vadd.f32 %v1460_v56, %v1331_v47  ;;  %v1461_v42 = vmul.f32 %v2764_v48, %v1396_v57  ;;  %v1205_v8 = vmul.f32 %v2755_v41, %v2884_v6  ;;  %v2937_v56 = vld [vmem:[#allocation9 + $0x68] sm:$0xff] }
  0x94   :  { %2289 = vmatprep.subr.bf16.mxu0 %v2766_v49  ;;  %v1333_v11 = vadd.f32 %v1269_v60, %v1204_v1  ;;  %v1462_v12 = vmul.f32 %v2764_v48, %v1397_v2  ;;  %v1398_v13 = vmul.f32 %v2875_v62, %v2884_v6  ;;  %v1271_v43 = vmul.f32 %v2748_v34, %v2893_v9  ;;  %v2946_v2 = vld [vmem:[#allocation6 + $0x68] sm:$0xff] }
  0x95   :  { %3984 = vst [vmem:[#allocation31_spill] sm:$0xff] %v2888_v7  ;;  %v2903_v17 = vadd.f32 %v1461_v42, %v1332_v0  ;;  %v1334_v20 = vadd.f32 %v1270_v3, %v1205_v8  ;;  %v1206_v21 = vmul.f32 %v2755_v41, %v2901_v16  ;;  %v1399_v22 = vmul.f32 %v2893_v9, %v2901_v16  ;;  %v2948_v3 = vld [vmem:[#allocation9 + $0x70] sm:$0xff] }
  0x96   :  { %2259 = vmatpush3.bf16.msra.mxu1 %v2761_v44  ;;  %v2914_v28 = vadd.f32 %v1462_v12, %v1333_v11  ;;  %v1463_v29 = vmul.f32 %v2764_v48, %v1398_v13  ;;  %v1272_v32 = vmul.f32 %v2748_v34, %v2909_v26  ;;  %v1207_v33 = vmul.f32 %v2755_v41, %v2911_v27  ;;  %v2957_v13 = vld [vmem:[#allocation6 + $0x70] sm:$0xff] }
  0x97   :  { %3985 = vst [vmem:[#allocation32_spill] sm:$0xff] %v2903_v17  ;;  %2291 = vmatpush3.bf16.msra.mxu0 %v2766_v49  ;;  %2261 = vmatprep.subr.bf16.mxu1 %v2768_v50  ;;  %v1335_v35 = vadd.f32 %v1271_v43, %v1206_v21  ;;  %v1464_v38 = vmul.f32 %v2764_v48, %v1399_v22  ;;  %v2967_v22 = vld [vmem:[#allocation9 + $0x78] sm:$0xff] }
  0x98   :  { %3986 = vst [vmem:[#allocation33_spill] sm:$0xff] %v2914_v28  ;;  %v1400_v44 = vmul.f32 %v2909_v26, %v2911_v27  ;;  %2293 = vmatprep.subr.bf16.mxu0 %v2770_v51  ;;  %v2931_v47 = vadd.f32 %v1463_v29, %v1334_v20  ;;  %v1336_v37 = vadd.f32 %v1272_v32, %v1207_v33  ;;  %v2969_v29 = vld [vmem:[#allocation6 + $0x78] sm:$0xff] }
  0x99   :  { %v1273_v49 = vmul.f32 %v2748_v34, %v2926_v39  ;;  %v1208_v52 = vmul.f32 %v2755_v41, %v2928_v40  ;;  %v2939_v57 = vadd.f32 %v1464_v38, %v1335_v35  ;;  %v1401_v0 = vmul.f32 %v2926_v39, %v2928_v40 }
  0x9a   :  { %3987 = vst [vmem:[#allocation34_spill] sm:$0xff] %v2931_v47  ;;  %v1465_v60 = vmul.f32 %v2764_v48, %v1400_v44  ;;  %v1274_v1 = vmul.f32 %v2748_v34, %v2937_v56  ;;  %2263 = vmatpush3.bf16.msra.mxu1 %v2768_v50  ;;  %v1209_v8 = vmul.f32 %v2755_v41, %v2946_v2 }
  0x9b   :  { %3988 = vst [vmem:[#allocation35_spill] sm:$0xff] %v2939_v57  ;;  %v1337_v42 = vadd.f32 %v1273_v49, %v1208_v52  ;;  %v1402_v11 = vmul.f32 %v2937_v56, %v2946_v2  ;;  %v1275_v12 = vmul.f32 %v2748_v34, %v2948_v3  ;;  %2295 = vmatpush3.bf16.msra.mxu0 %v2770_v51  ;;  %v2982_v52 = vld [vmem:[#allocation9 + $0x80] sm:$0xff] }
  0x9c   :  { %v2960_v43 = vadd.f32 %v1465_v60, %v1336_v37  ;;  %v1466_v20 = vmul.f32 %v2764_v48, %v1401_v0  ;;  %v1210_v50 = vmul.f32 %v2755_v41, %v2957_v13  ;;  %v1403_v21 = vmul.f32 %v2948_v3, %v2957_v13 }
  0x9d   :  { %v1338_v32 = vadd.f32 %v1274_v1, %v1209_v8  ;;  %v1467_v33 = vmul.f32 %v2764_v48, %v1402_v11  ;;  %v1276_v51 = vmul.f32 %v2748_v34, %v2967_v22  ;;  %v1211_v35 = vmul.f32 %v2755_v41, %v2969_v29  ;;  %2009 = vmatmul.mubr.f32.vlgmr.msra.gmra.mrb[0].mxu1 %v2773_v54  ;;  %v2990_v1 = vld [vmem:[#allocation6 + $0x80] sm:$0xff] }
  0x9e   :  { %3989 = vst [vmem:[#allocation36_spill] sm:$0xff] %v2960_v43  ;;  %v2977_v38 = vadd.f32 %v1466_v20, %v1337_v42  ;;  %v1339_v44 = vadd.f32 %v1275_v12, %v1210_v50  ;;  %v1468_v37 = vmul.f32 %v2764_v48, %v1403_v21  ;;  %v1404_v49 = vmul.f32 %v2967_v22, %v2969_v29  ;;  %v3002_v12 = vld [vmem:[#allocation6 + $0x88] sm:$0xff]  ;;  %v3004_v20 = vld [vmem:[#allocation9 + $0x90] sm:$0xff] }
  0x9f   :  { %2137 = vmatmul.mubr.f32.vlgmr.msra.gmra.mrb[0].mxu0 %v2778_v58  ;;  %2011 = vmatprep.mubr.f32.mxu1 %v2780_v59  ;;  %v2986_v60 = vadd.f32 %v1467_v33, %v1338_v32  ;;  %v1340_v0 = vadd.f32 %v1276_v51, %v1211_v35  ;;  %v1277_v54 = vmul.f32 %v2748_v34, %v2982_v52  ;;  %v3000_v59 = vld [vmem:[#allocation9 + $0x88] sm:$0xff]  ;;  %v3014_v33 = vld [vmem:[#allocation6 + $0x90] sm:$0xff] }
  0xa0   :  { %3990 = vst [vmem:[#allocation37_spill] sm:$0xff] %v2977_v38  ;;  %2139 = vmatprep.mubr.f32.mxu0 %v2788_v63  ;;  %v2993_v42 = vadd.f32 %v1468_v37, %v1339_v44  ;;  %v1469_v8 = vmul.f32 %v2764_v48, %v1404_v49  ;;  %v1212_v11 = vmul.f32 %v2755_v41, %v2990_v1 }
  0xa1   :  { %3991 = vst [vmem:[#allocation38_spill] sm:$0xff] %v2986_v60  ;;  %v1405_v58 = vmul.f32 %v2982_v52, %v2990_v1  ;;  %v1278_v50 = vmul.f32 %v2748_v34, %v3000_v59  ;;  %v1213_v63 = vmul.f32 %v2755_v41, %v3002_v12  ;;  %v1406_v21 = vmul.f32 %v3000_v59, %v3002_v12  ;;  %v3027_v60 = vld [vmem:[#allocation9 + $0x98] sm:$0xff] }
  0xa2   :  { %3992 = vst [vmem:[#allocation39_spill] sm:$0xff] %v2993_v42  ;;  %v1279_v32 = vmul.f32 %v2748_v34, %v3004_v20  ;;  %2012 = vmatmul.mubr.f32.gmra.mrb[2].mxu1 %v2795_v4  ;;  %v3017_v51 = vadd.f32 %v1469_v8, %v1340_v0  ;;  %v1341_v35 = vadd.f32 %v1277_v54, %v1212_v11  ;;  %v3029_v4 = vld [vmem:[#allocation6 + $0x98] sm:$0xff]  ;;  %v3038_v8 = vld [vmem:[#allocation9 + $0xa0] sm:$0xff] }
  0xa3   :  { %v1470_v44 = vmul.f32 %v2764_v48, %v1405_v58  ;;  %v1214_v37 = vmul.f32 %v2755_v41, %v3014_v33  ;;  %2140 = vmatmul.mubr.f32.gmra.mrb[2].mxu0 %v2797_v5  ;;  %2014 = vmatprep.mubr.f32.mxu1 %v2809_v14  ;;  %v1342_v49 = vadd.f32 %v1278_v50, %v1213_v63  ;;  %v3047_v63 = vld [vmem:[#allocation6 + $0xa0] sm:$0xff] }
  0xa4   :  { %3993 = vst [vmem:[#allocation40_spill] sm:$0xff] %v3017_v51  ;;  %v1471_v42 = vmul.f32 %v2764_v48, %v1406_v21  ;;  %v1407_v38 = vmul.f32 %v3004_v20, %v3014_v33  ;;  %2142 = vmatprep.mubr.f32.mxu0 %v2816_v18  ;;  %v1280_v5 = vmul.f32 %v2748_v34, %v3027_v60  ;;  %v3049_v21 = vld [vmem:[#allocation9 + $0xa8] sm:$0xff] }
  0xa5   :  { %v3032_v0 = vadd.f32 %v1470_v44, %v1341_v35  ;;  %v1343_v54 = vadd.f32 %v1279_v32, %v1214_v37  ;;  %v1215_v14 = vmul.f32 %v2755_v41, %v3029_v4  ;;  %v1408_v50 = vmul.f32 %v3027_v60, %v3029_v4  ;;  %v3058_v44 = vld [vmem:[#allocation6 + $0xa8] sm:$0xff] }
  0xa6   :  { %v3040_v11 = vadd.f32 %v1471_v42, %v1342_v49  ;;  %v1472_v58 = vmul.f32 %v2764_v48, %v1407_v38  ;;  %v1281_v18 = vmul.f32 %v2748_v34, %v3038_v8  ;;  %2015 = vmatmul.mubr.f32.gmra.mrb[4].mxu1 %v2826_v23  ;;  %v1216_v35 = vmul.f32 %v2755_v41, %v3047_v63 }
  0xa7   :  { %3994 = vst [vmem:[#allocation41_spill] sm:$0xff] %v3032_v0  ;;  %v1344_v32 = vadd.f32 %v1280_v5, %v1215_v14  ;;  %v1409_v42 = vmul.f32 %v3038_v8, %v3047_v63  ;;  %v1282_v38 = vmul.f32 %v2748_v34, %v3049_v21  ;;  %2143 = vmatmul.mubr.f32.gmra.mrb[4].mxu0 %v2828_v24  ;;  %v3067_v5 = vld [vmem:[#allocation9 + $0xb0] sm:$0xff] }
  0xa8   :  { %3995 = vst [vmem:[#allocation42_spill] sm:$0xff] %v3040_v11  ;;  %2017 = vmatprep.mubr.f32.mxu1 %v2830_v25  ;;  %v3062_v37 = vadd.f32 %v1472_v58, %v1343_v54  ;;  %v1473_v23 = vmul.f32 %v2764_v48, %v1408_v50  ;;  %v1217_v49 = vmul.f32 %v2755_v41, %v3058_v44  ;;  %v3075_v25 = vld [vmem:[#allocation6 + $0xb0] sm:$0xff] }
  0xa9   :  { %2145 = vmatprep.mubr.f32.mxu0 %v2840_v30  ;;  %v1345_v14 = vadd.f32 %v1281_v18, %v1216_v35  ;;  %v1474_v0 = vmul.f32 %v2764_v48, %v1409_v42  ;;  %v1410_v11 = vmul.f32 %v3049_v21, %v3058_v44  ;;  %v1283_v24 = vmul.f32 %v2748_v34, %v3067_v5  ;;  %v3083_v18 = vld [vmem:[#allocation9 + $0xb8] sm:$0xff] }
  0xaa   :  { %3996 = vst [vmem:[#allocation43_spill] sm:$0xff] %v3062_v37  ;;  %v3077_v54 = vadd.f32 %v1473_v23, %v1344_v32  ;;  %v1346_v58 = vadd.f32 %v1282_v38, %v1217_v49  ;;  %v1218_v50 = vmul.f32 %v2755_v41, %v3075_v25  ;;  %v1411_v30 = vmul.f32 %v3067_v5, %v3075_v25  ;;  %v3085_v35 = vld [vmem:[#allocation6 + $0xb8] sm:$0xff] }
  0xab   :  { %2018 = vmatmul.mubr.f32.gmra.mrb[6].mxu1 %v2853_v45  ;;  %v3088_v42 = vadd.f32 %v1474_v0, %v1345_v14  ;;  %v1475_v37 = vmul.f32 %v2764_v48, %v1410_v11  ;;  %v1284_v32 = vmul.f32 %v2748_v34, %v3083_v18  ;;  %v1219_v38 = vmul.f32 %v2755_v41, %v3085_v35  ;;  %v3100_v0 = vld [vmem:[#allocation9 + $0xc0] sm:$0xff] }
  0xac   :  { %3997 = vst [vmem:[#allocation44_spill] sm:$0xff] %v3077_v54  ;;  %2146 = vmatmul.mubr.f32.gmra.mrb[6].mxu0 %v2855_v36  ;;  %2020 = vmatprep.mubr.f32.mxu1 %v2864_v53  ;;  %v1347_v23 = vadd.f32 %v1283_v24, %v1218_v50  ;;  %v1476_v49 = vmul.f32 %v2764_v48, %v1411_v30  ;;  %v3102_v14 = vld [vmem:[#allocation6 + $0xc0] sm:$0xff]  ;;  %v3111_v24 = vld [vmem:[#allocation9 + $0xc8] sm:$0xff] }
  0xad   :  { %3998 = vst [vmem:[#allocation45_spill] sm:$0xff] %v3088_v42  ;;  %v1412_v45 = vmul.f32 %v3083_v18, %v3085_v35  ;;  %2148 = vmatprep.mubr.f32.mxu0 %v2873_v61  ;;  %v3105_v11 = vadd.f32 %v1475_v37, %v1346_v58  ;;  %v1348_v42 = vadd.f32 %v1284_v32, %v1219_v38  ;;  %v3120_v37 = vld [vmem:[#allocation6 + $0xc8] sm:$0xff]  ;;  %v3122_v58 = vld [vmem:[#allocation9 + $0xd0] sm:$0xff] }
  0xae   :  { %v1285_v36 = vmul.f32 %v2748_v34, %v3100_v0  ;;  %v1220_v53 = vmul.f32 %v2755_v41, %v3102_v14  ;;  %v3113_v50 = vadd.f32 %v1476_v49, %v1347_v23  ;;  %v1413_v54 = vmul.f32 %v3100_v0, %v3102_v14 }
  0xaf   :  { %3999 = vst [vmem:[#allocation46_spill] sm:$0xff] %v3105_v11  ;;  %v1477_v30 = vmul.f32 %v2764_v48, %v1412_v45  ;;  %v1286_v61 = vmul.f32 %v2748_v34, %v3111_v24  ;;  %2021 = vmatmul.mubr.f32.gmra.mrb[8].mxu1 %v2875_v62  ;;  %v1221_v38 = vmul.f32 %v2755_v41, %v3120_v37  ;;  %v3131_v45 = vld [vmem:[#allocation6 + $0xd0] sm:$0xff] }
  0xb0   :  { %4000 = vst [vmem:[#allocation47_spill] sm:$0xff] %v3113_v50  ;;  %v1349_v32 = vadd.f32 %v1285_v36, %v1220_v53  ;;  %v1414_v23 = vmul.f32 %v3111_v24, %v3120_v37  ;;  %v1287_v49 = vmul.f32 %v2748_v34, %v3122_v58  ;;  %2149 = vmatmul.mubr.f32.gmra.mrb[8].mxu0 %v2884_v6  ;;  %v3140_v53 = vld [vmem:[#allocation9 + $0xd8] sm:$0xff] }
  0xb1   :  { %2023 = vmatprep.mubr.f32.mxu1 %v2893_v9  ;;  %v3135_v50 = vadd.f32 %v1477_v30, %v1348_v42  ;;  %v1478_v62 = vmul.f32 %v2764_v48, %v1413_v54  ;;  %v1222_v36 = vmul.f32 %v2755_v41, %v3131_v45  ;;  %2151 = vmatprep.mubr.f32.mxu0 %v2901_v16  ;;  %v3148_v9 = vld [vmem:[#allocation6 + $0xd8] sm:$0xff] }
  0xb2   :  { %v1350_v11 = vadd.f32 %v1286_v61, %v1221_v38  ;;  %v1479_v51 = vmul.f32 %v2764_v48, %v1414_v23  ;;  %v1415_v57 = vmul.f32 %v3122_v58, %v3131_v45  ;;  %v1288_v6 = vmul.f32 %v2748_v34, %v3140_v53  ;;  %v3156_v61 = vld [vmem:[#allocation9 + $0xe0] sm:$0xff] }
  0xb3   :  { %4001 = vst [vmem:[#allocation48_spill] sm:$0xff] %v3135_v50  ;;  %v3150_v42 = vadd.f32 %v1478_v62, %v1349_v32  ;;  %v1351_v54 = vadd.f32 %v1287_v49, %v1222_v36  ;;  %v1223_v30 = vmul.f32 %v2755_v41, %v3148_v9  ;;  %v1416_v16 = vmul.f32 %v3140_v53, %v3148_v9  ;;  %v3158_v38 = vld [vmem:[#allocation6 + $0xe0] sm:$0xff] }
  0xb4   :  { %2024 = vmatmul.mubr.f32.gmra.mrb[10].mxu1 %v2909_v26  ;;  %v3161_v23 = vadd.f32 %v1479_v51, %v1350_v11  ;;  %v1480_v50 = vmul.f32 %v2764_v48, %v1415_v57  ;;  %v1289_v32 = vmul.f32 %v2748_v34, %v3156_v61  ;;  %v1224_v49 = vmul.f32 %v2755_v41, %v3158_v38  ;;  %v3173_v51 = vld [vmem:[#allocation9 + $0xe8] sm:$0xff] }
  0xb5   :  { %4002 = vst [vmem:[#allocation49_spill] sm:$0xff] %v3150_v42  ;;  %2152 = vmatmul.mubr.f32.gmra.mrb[10].mxu0 %v2911_v27  ;;  %2026 = vmatprep.mubr.f32.mxu1 %v2926_v39  ;;  %v1352_v62 = vadd.f32 %v1288_v6, %v1223_v30  ;;  %v1481_v36 = vmul.f32 %v2764_v48, %v1416_v16  ;;  %v3175_v11 = vld [vmem:[#allocation6 + $0xe8] sm:$0xff]  ;;  %v3184_v6 = vld [vmem:[#allocation9 + $0xf0] sm:$0xff] }
  0xb6   :  { %4003 = vst [vmem:[#allocation50_spill] sm:$0xff] %v3161_v23  ;;  %v1417_v26 = vmul.f32 %v3156_v61, %v3158_v38  ;;  %2154 = vmatprep.mubr.f32.mxu0 %v2928_v40  ;;  %v3178_v57 = vadd.f32 %v1480_v50, %v1351_v54  ;;  %v1353_v42 = vadd.f32 %v1289_v32, %v1224_v49  ;;  %v3193_v50 = vld [vmem:[#allocation6 + $0xf0] sm:$0xff]  ;;  %v3195_v54 = vld [vmem:[#allocation9 + $0xf8] sm:$0xff] }
  0xb7   :  { %v1290_v27 = vmul.f32 %v2748_v34, %v3173_v51  ;;  %v1225_v39 = vmul.f32 %v2755_v41, %v3175_v11  ;;  %v3186_v30 = vadd.f32 %v1481_v36, %v1352_v62  ;;  %v1418_v23 = vmul.f32 %v3173_v51, %v3175_v11 }
  0xb8   :  { %4004 = vst [vmem:[#allocation51_spill] sm:$0xff] %v3178_v57  ;;  %v1482_v16 = vmul.f32 %v2764_v48, %v1417_v26  ;;  %v1291_v40 = vmul.f32 %v2748_v34, %v3184_v6  ;;  %2027 = vmatmul.mubr.f32.gmra.mrb[12].mxu1 %v2937_v56  ;;  %v1226_v49 = vmul.f32 %v2755_v41, %v3193_v50  ;;  %v3204_v26 = vld [vmem:[#allocation6 + $0xf8] sm:$0xff] }
  0xb9   :  { %4005 = vst [vmem:[#allocation52_spill] sm:$0xff] %v3186_v30  ;;  %v1354_v32 = vadd.f32 %v1290_v27, %v1225_v39  ;;  %v1419_v62 = vmul.f32 %v3184_v6, %v3193_v50  ;;  %v1292_v36 = vmul.f32 %v2748_v34, %v3195_v54  ;;  %2155 = vmatmul.mubr.f32.gmra.mrb[12].mxu0 %v2946_v2  ;;  %v3213_v39 = vld [vmem:[#allocation10] sm:$0xff] }
  0xba   :  { %2029 = vmatprep.mubr.f32.mxu1 %v2948_v3  ;;  %v3208_v57 = vadd.f32 %v1482_v16, %v1353_v42  ;;  %v1483_v56 = vmul.f32 %v2764_v48, %v1418_v23  ;;  %v1227_v27 = vmul.f32 %v2755_v41, %v3204_v26  ;;  %2157 = vmatprep.mubr.f32.mxu0 %v2957_v13  ;;  %v3221_v3 = vld [vmem:[#allocation7] sm:$0xff] }
  0xbb   :  { %v1355_v30 = vadd.f32 %v1291_v40, %v1226_v49  ;;  %v1484_v43 = vmul.f32 %v2764_v48, %v1419_v62  ;;  %v1420_v28 = vmul.f32 %v3195_v54, %v3204_v26  ;;  %v1293_v2 = vmul.f32 %v2748_v34, %v3213_v39  ;;  %v3229_v40 = vld [vmem:[#allocation10 + $0x8] sm:$0xff] }
  0xbc   :  { %4006 = vst [vmem:[#allocation53_spill] sm:$0xff] %v3208_v57  ;;  %v3223_v42 = vadd.f32 %v1483_v56, %v1354_v32  ;;  %v1356_v23 = vadd.f32 %v1292_v36, %v1227_v27  ;;  %v1228_v16 = vmul.f32 %v2755_v41, %v3221_v3  ;;  %v1421_v13 = vmul.f32 %v3213_v39, %v3221_v3  ;;  %v3231_v49 = vld [vmem:[#allocation7 + $0x8] sm:$0xff] }
  0xbd   :  { %2030 = vmatmul.mubr.f32.gmra.mrb[14].mxu1 %v2967_v22  ;;  %v3234_v62 = vadd.f32 %v1484_v43, %v1355_v30  ;;  %v1485_v57 = vmul.f32 %v2764_v48, %v1420_v28  ;;  %v1294_v32 = vmul.f32 %v2748_v34, %v3229_v40  ;;  %v1229_v36 = vmul.f32 %v2755_v41, %v3231_v49  ;;  %v3246_v43 = vld [vmem:[#allocation10 + $0x10] sm:$0xff] }
  0xbe   :  { %4007 = vst [vmem:[#allocation54_spill] sm:$0xff] %v3223_v42  ;;  %2158 = vmatmul.mubr.f32.gmra.mrb[14].mxu0 %v2969_v29  ;;  %2032 = vmatprep.mubr.f32.mxu1 %v2982_v52  ;;  %v1357_v56 = vadd.f32 %v1293_v2, %v1228_v16  ;;  %v1486_v27 = vmul.f32 %v2764_v48, %v1421_v13  ;;  %v3248_v30 = vld [vmem:[#allocation7 + $0x10] sm:$0xff]  ;;  %v3257_v2 = vld [vmem:[#allocation10 + $0x18] sm:$0xff] }
  0xbf   :  { %4008 = vst [vmem:[#allocation55_spill] sm:$0xff] %v3234_v62  ;;  %v1422_v22 = vmul.f32 %v3229_v40, %v3231_v49  ;;  %2160 = vmatprep.mubr.f32.mxu0 %v2990_v1  ;;  %v3251_v28 = vadd.f32 %v1485_v57, %v1356_v23  ;;  %v1358_v62 = vadd.f32 %v1294_v32, %v1229_v36  ;;  %v3266_v57 = vld [vmem:[#allocation7 + $0x18] sm:$0xff]  ;;  %v3268_v23 = vld [vmem:[#allocation10 + $0x20] sm:$0xff] }
  0xc0   :  { %v1295_v29 = vmul.f32 %v2748_v34, %v3246_v43  ;;  %v1230_v52 = vmul.f32 %v2755_v41, %v3248_v30  ;;  %v3259_v16 = vadd.f32 %v1486_v27, %v1357_v56  ;;  %v1423_v42 = vmul.f32 %v3246_v43, %v3248_v30 }
  0xc1   :  { %4009 = vst [vmem:[#allocation56_spill] sm:$0xff] %v3251_v28  ;;  %v1487_v13 = vmul.f32 %v2764_v48, %v1422_v22  ;;  %v1296_v1 = vmul.f32 %v2748_v34, %v3257_v2  ;;  %2033 = vmatmul.mubr.f32.gmra.mrb[16].mxu1 %v3000_v59  ;;  %v1231_v36 = vmul.f32 %v2755_v41, %v3266_v57  ;;  %v3277_v22 = vld [vmem:[#allocation7 + $0x20] sm:$0xff] }
  0xc2   :  { %4010 = vst [vmem:[#allocation57_spill] sm:$0xff] %v3259_v16  ;;  %v1359_v32 = vadd.f32 %v1295_v29, %v1230_v52  ;;  %v1424_v56 = vmul.f32 %v3257_v2, %v3266_v57  ;;  %v1297_v27 = vmul.f32 %v2748_v34, %v3268_v23  ;;  %2161 = vmatmul.mubr.f32.gmra.mrb[16].mxu0 %v3002_v12  ;;  %v3286_v52 = vld [vmem:[#allocation10 + $0x28] sm:$0xff] }
  0xc3   :  { %2035 = vmatprep.mubr.f32.mxu1 %v3004_v20  ;;  %v3281_v16 = vadd.f32 %v1487_v13, %v1358_v62  ;;  %v1488_v59 = vmul.f32 %v2764_v48, %v1423_v42  ;;  %v1232_v29 = vmul.f32 %v2755_v41, %v3277_v22  ;;  %2163 = vmatprep.mubr.f32.mxu0 %v3014_v33  ;;  %v3294_v20 = vld [vmem:[#allocation7 + $0x28] sm:$0xff] }
  0xc4   :  { %v1360_v28 = vadd.f32 %v1296_v1, %v1231_v36  ;;  %v1489_v47 = vmul.f32 %v2764_v48, %v1424_v56  ;;  %v1425_v7 = vmul.f32 %v3268_v23, %v3277_v22  ;;  %v1298_v12 = vmul.f32 %v2748_v34, %v3286_v52  ;;  %v3302_v1 = vld [vmem:[#allocation10 + $0x30] sm:$0xff] }
  0xc5   :  { %4011 = vst [vmem:[#allocation58_spill] sm:$0xff] %v3281_v16  ;;  %v3296_v62 = vadd.f32 %v1488_v59, %v1359_v32  ;;  %v1361_v42 = vadd.f32 %v1297_v27, %v1232_v29  ;;  %v1233_v13 = vmul.f32 %v2755_v41, %v3294_v20  ;;  %v1426_v33 = vmul.f32 %v3286_v52, %v3294_v20  ;;  %v3304_v36 = vld [vmem:[#allocation7 + $0x30] sm:$0xff] }
  0xc6   :  { %2036 = vmatmul.mubr.f32.gmra.mrb[18].mxu1 %v3027_v60  ;;  %v3307_v56 = vadd.f32 %v1489_v47, %v1360_v28  ;;  %v1490_v16 = vmul.f32 %v2764_v48, %v1425_v7  ;;  %v1299_v32 = vmul.f32 %v2748_v34, %v3302_v1  ;;  %v1234_v27 = vmul.f32 %v2755_v41, %v3304_v36  ;;  %v3319_v47 = vld [vmem:[#allocation10 + $0x38] sm:$0xff] }
  0xc7   :  { %4012 = vst [vmem:[#allocation59_spill] sm:$0xff] %v3296_v62  ;;  %2164 = vmatmul.mubr.f32.gmra.mrb[18].mxu0 %v3029_v4  ;;  %2038 = vmatprep.mubr.f32.mxu1 %v3038_v8  ;;  %v1362_v59 = vadd.f32 %v1298_v12, %v1233_v13  ;;  %v1491_v29 = vmul.f32 %v2764_v48, %v1426_v33  ;;  %v3321_v28 = vld [vmem:[#allocation7 + $0x38] sm:$0xff]  ;;  %v3330_v12 = vld [vmem:[#allocation10 + $0x40] sm:$0xff] }
  0xc8   :  { %4013 = vst [vmem:[#allocation60_spill] sm:$0xff] %v3307_v56  ;;  %v1427_v60 = vmul.f32 %v3302_v1, %v3304_v36  ;;  %2166 = vmatprep.mubr.f32.mxu0 %v3047_v63  ;;  %v3324_v7 = vadd.f32 %v1490_v16, %v1361_v42  ;;  %v1363_v62 = vadd.f32 %v1299_v32, %v1234_v27  ;;  %v3339_v16 = vld [vmem:[#allocation7 + $0x40] sm:$0xff]  ;;  %v3341_v42 = vld [vmem:[#allocation10 + $0x48] sm:$0xff] }
  0xc9   :  { %v1300_v4 = vmul.f32 %v2748_v34, %v3319_v47  ;;  %v1235_v8 = vmul.f32 %v2755_v41, %v3321_v28  ;;  %v3332_v13 = vadd.f32 %v1491_v29, %v1362_v59  ;;  %v1428_v56 = vmul.f32 %v3319_v47, %v3321_v28 }
  0xca   :  { %4014 = vst [vmem:[#allocation61_spill] sm:$0xff] %v3324_v7  ;;  %v1492_v33 = vmul.f32 %v2764_v48, %v1427_v60  ;;  %v1301_v63 = vmul.f32 %v2748_v34, %v3330_v12  ;;  %2039 = vmatmul.mubr.f32.gmra.mrb[20].mxu1 %v3049_v21  ;;  %v1236_v27 = vmul.f32 %v2755_v41, %v3339_v16  ;;  %v3350_v60 = vld [vmem:[#allocation7 + $0x48] sm:$0xff] }
  0xcb   :  { %4015 = vst [vmem:[#allocation62_spill] sm:$0xff] %v3332_v13  ;;  %v1364_v32 = vadd.f32 %v1300_v4, %v1235_v8  ;;  %v1429_v59 = vmul.f32 %v3330_v12, %v3339_v16  ;;  %v1302_v29 = vmul.f32 %v2748_v34, %v3341_v42  ;;  %2167 = vmatmul.mubr.f32.gmra.mrb[20].mxu0 %v3058_v44  ;;  %v3359_v8 = vld [vmem:[#allocation10 + $0x50] sm:$0xff] }
  0xcc   :  { %2041 = vmatprep.mubr.f32.mxu1 %v3067_v5  ;;  %v3354_v7 = vadd.f32 %v1492_v33, %v1363_v62  ;;  %v1493_v21 = vmul.f32 %v2764_v48, %v1428_v56  ;;  %v1237_v4 = vmul.f32 %v2755_v41, %v3350_v60  ;;  %2169 = vmatprep.mubr.f32.mxu0 %v3075_v25  ;;  %v3367_v5 = vld [vmem:[#allocation7 + $0x50] sm:$0xff] }
  0xcd   :  { %v1365_v13 = vadd.f32 %v1301_v63, %v1236_v27  ;;  %v1494_v17 = vmul.f32 %v2764_v48, %v1429_v59  ;;  %v1430_v46 = vmul.f32 %v3341_v42, %v3350_v60  ;;  %v1303_v44 = vmul.f32 %v2748_v34, %v3359_v8  ;;  %v3375_v63 = vld [vmem:[#allocation10 + $0x58] sm:$0xff] }
  0xce   :  { %4016 = vst [vmem:[#allocation63_spill] sm:$0xff] %v3354_v7  ;;  %v3369_v62 = vadd.f32 %v1493_v21, %v1364_v32  ;;  %v1366_v56 = vadd.f32 %v1302_v29, %v1237_v4  ;;  %v1238_v33 = vmul.f32 %v2755_v41, %v3367_v5  ;;  %v1431_v25 = vmul.f32 %v3359_v8, %v3367_v5  ;;  %v3377_v27 = vld [vmem:[#allocation7 + $0x58] sm:$0xff] }
  0xcf   :  { %2042 = vmatmul.mubr.f32.gmra.mrb[22].mxu1 %v3083_v18  ;;  %v3380_v59 = vadd.f32 %v1494_v17, %v1365_v13  ;;  %v1495_v7 = vmul.f32 %v2764_v48, %v1430_v46  ;;  %v1304_v32 = vmul.f32 %v2748_v34, %v3375_v63  ;;  %v1239_v29 = vmul.f32 %v2755_v41, %v3377_v27  ;;  %v3392_v17 = vld [vmem:[#allocation10 + $0x60] sm:$0xff] }
  0xd0   :  { %4017 = vst [vmem:[#allocation64_spill] sm:$0xff] %v3369_v62  ;;  %2170 = vmatmul.mubr.f32.gmra.mrb[22].mxu0 %v3085_v35  ;;  %2044 = vmatprep.mubr.f32.mxu1 %v3100_v0  ;;  %v1367_v21 = vadd.f32 %v1303_v44, %v1238_v33  ;;  %v1496_v4 = vmul.f32 %v2764_v48, %v1431_v25  ;;  %v3394_v13 = vld [vmem:[#allocation7 + $0x60] sm:$0xff]  ;;  %v3403_v44 = vld [vmem:[#allocation10 + $0x68] sm:$0xff] }
  0xd1   :  { %4018 = vst [vmem:[#allocation65_spill] sm:$0xff] %v3380_v59  ;;  %v1432_v18 = vmul.f32 %v3375_v63, %v3377_v27  ;;  %2172 = vmatprep.mubr.f32.mxu0 %v3102_v14  ;;  %v3397_v46 = vadd.f32 %v1495_v7, %v1366_v56  ;;  %v1368_v59 = vadd.f32 %v1304_v32, %v1239_v29  ;;  %v3412_v7 = vld [vmem:[#allocation7 + $0x68] sm:$0xff]  ;;  %v3414_v56 = vld [vmem:[#allocation10 + $0x70] sm:$0xff] }
  0xd2   :  { %v1305_v35 = vmul.f32 %v2748_v34, %v3392_v17  ;;  %v1240_v0 = vmul.f32 %v2755_v41, %v3394_v13  ;;  %v3405_v33 = vadd.f32 %v1496_v4, %v1367_v21  ;;  %v1433_v62 = vmul.f32 %v3392_v17, %v3394_v13 }
  0xd3   :  { %4019 = vst [vmem:[#allocation66_spill] sm:$0xff] %v3397_v46  ;;  %v1497_v25 = vmul.f32 %v2764_v48, %v1432_v18  ;;  %v1306_v14 = vmul.f32 %v2748_v34, %v3403_v44  ;;  %2045 = vmatmul.mubr.f32.gmra.mrb[24].mxu1 %v3111_v24  ;;  %v1241_v29 = vmul.f32 %v2755_v41, %v3412_v7  ;;  %v3423_v18 = vld [vmem:[#allocation7 + $0x70] sm:$0xff] }
  0xd4   :  { %4020 = vst [vmem:[#allocation67_spill] sm:$0xff] %v3405_v33  ;;  %v1369_v32 = vadd.f32 %v1305_v35, %v1240_v0  ;;  %v1434_v21 = vmul.f32 %v3403_v44, %v3412_v7  ;;  %v1307_v4 = vmul.f32 %v2748_v34, %v3414_v56  ;;  %2173 = vmatmul.mubr.f32.gmra.mrb[24].mxu0 %v3120_v37  ;;  %v3432_v0 = vld [vmem:[#allocation10 + $0x78] sm:$0xff] }
  0xd5   :  { %2047 = vmatprep.mubr.f32.mxu1 %v3122_v58  ;;  %v3427_v33 = vadd.f32 %v1497_v25, %v1368_v59  ;;  %v1498_v24 = vmul.f32 %v2764_v48, %v1433_v62  ;;  %v1242_v35 = vmul.f32 %v2755_v41, %v3423_v18  ;;  %2175 = vmatprep.mubr.f32.mxu0 %v3131_v45  ;;  %v3440_v58 = vld [vmem:[#allocation7 + $0x78] sm:$0xff] }
  0xd6   :  { %v1370_v46 = vadd.f32 %v1306_v14, %v1241_v29  ;;  %v1499_v55 = vmul.f32 %v2764_v48, %v1434_v21  ;;  %v1435_v19 = vmul.f32 %v3414_v56, %v3423_v18  ;;  %v1308_v37 = vmul.f32 %v2748_v34, %v3432_v0  ;;  %v3448_v14 = vld [vmem:[#allocation10 + $0x80] sm:$0xff] }
  0xd7   :  { %4021 = vst [vmem:[#allocation68_spill] sm:$0xff] %v3427_v33  ;;  %v3442_v59 = vadd.f32 %v1498_v24, %v1369_v32  ;;  %v1371_v62 = vadd.f32 %v1307_v4, %v1242_v35  ;;  %v1243_v25 = vmul.f32 %v2755_v41, %v3440_v58  ;;  %v1436_v45 = vmul.f32 %v3432_v0, %v3440_v58  ;;  %v3450_v29 = vld [vmem:[#allocation7 + $0x80] sm:$0xff] }
  0xd8   :  { %2048 = vmatmul.mubr.f32.gmra.mrb[26].mxu1 %v3140_v53  ;;  %v3453_v21 = vadd.f32 %v1499_v55, %v1370_v46  ;;  %v1500_v33 = vmul.f32 %v2764_v48, %v1435_v19  ;;  %v1309_v32 = vmul.f32 %v2748_v34, %v3448_v14  ;;  %v1244_v4 = vmul.f32 %v2755_v41, %v3450_v29  ;;  %v3465_v55 = vld [vmem:[#allocation10 + $0x88] sm:$0xff] }
  0xd9   :  { %4022 = vst [vmem:[#allocation69_spill] sm:$0xff] %v3442_v59  ;;  %2176 = vmatmul.mubr.f32.gmra.mrb[26].mxu0 %v3148_v9  ;;  %2050 = vmatprep.mubr.f32.mxu1 %v3156_v61  ;;  %v1372_v24 = vadd.f32 %v1308_v37, %v1243_v25  ;;  %v1501_v35 = vmul.f32 %v2764_v48, %v1436_v45  ;;  %v3467_v46 = vld [vmem:[#allocation7 + $0x88] sm:$0xff]  ;;  %v3476_v37 = vld [vmem:[#allocation10 + $0x90] sm:$0xff] }
  0xda   :  { %4023 = vst [vmem:[#allocation70_spill] sm:$0xff] %v3453_v21  ;;  %v1437_v53 = vmul.f32 %v3448_v14, %v3450_v29  ;;  %2178 = vmatprep.mubr.f32.mxu0 %v3158_v38  ;;  %v3470_v19 = vadd.f32 %v1500_v33, %v1371_v62  ;;  %v1373_v59 = vadd.f32 %v1309_v32, %v1244_v4  ;;  %v3485_v33 = vld [vmem:[#allocation7 + $0x90] sm:$0xff]  ;;  %v3487_v62 = vld [vmem:[#allocation10 + $0x98] sm:$0xff] }
  0xdb   :  { %v1310_v9 = vmul.f32 %v2748_v34, %v3465_v55  ;;  %v1245_v61 = vmul.f32 %v2755_v41, %v3467_v46  ;;  %v3478_v25 = vadd.f32 %v1501_v35, %v1372_v24  ;;  %v1438_v21 = vmul.f32 %v3465_v55, %v3467_v46 }
  0xdc   :  { %4024 = vst [vmem:[#allocation71_spill] sm:$0xff] %v3470_v19  ;;  %v1502_v45 = vmul.f32 %v2764_v48, %v1437_v53  ;;  %v1311_v38 = vmul.f32 %v2748_v34, %v3476_v37  ;;  %2051 = vmatmul.mubr.f32.gmra.mrb[28].mxu1 %v3173_v51  ;;  %v1246_v4 = vmul.f32 %v2755_v41, %v3485_v33  ;;  %v3496_v53 = vld [vmem:[#allocation7 + $0x98] sm:$0xff] }
  0xdd   :  { %4025 = vst [vmem:[#allocation72_spill] sm:$0xff] %v3478_v25  ;;  %v1374_v32 = vadd.f32 %v1310_v9, %v1245_v61  ;;  %v1439_v24 = vmul.f32 %v3476_v37, %v3485_v33  ;;  %v1312_v35 = vmul.f32 %v2748_v34, %v3487_v62  ;;  %2179 = vmatmul.mubr.f32.gmra.mrb[28].mxu0 %v3175_v11  ;;  %v3505_v61 = vld [vmem:[#allocation10 + $0xa0] sm:$0xff] }
  0xde   :  { %2053 = vmatprep.mubr.f32.mxu1 %v3184_v6  ;;  %v3500_v19 = vadd.f32 %v1502_v45, %v1373_v59  ;;  %v1503_v51 = vmul.f32 %v2764_v48, %v1438_v21  ;;  %v1247_v9 = vmul.f32 %v2755_v41, %v3496_v53  ;;  %2181 = vmatprep.mubr.f32.mxu0 %v3193_v50  ;;  %v3513_v6 = vld [vmem:[#allocation7 + $0xa0] sm:$0xff] }
  0xdf   :  { %v1375_v25 = vadd.f32 %v1311_v38, %v1246_v4  ;;  %v1504_v31 = vmul.f32 %v2764_v48, %v1439_v24  ;;  %v1440_v10 = vmul.f32 %v3487_v62, %v3496_v53  ;;  %v1313_v11 = vmul.f32 %v2748_v34, %v3505_v61  ;;  %v3521_v38 = vld [vmem:[#allocation10 + $0xa8] sm:$0xff] }
  0xe0   :  { %4026 = vst [vmem:[#allocation73_spill] sm:$0xff] %v3500_v19  ;;  %v3515_v59 = vadd.f32 %v1503_v51, %v1374_v32  ;;  %v1376_v21 = vadd.f32 %v1312_v35, %v1247_v9  ;;  %v1248_v45 = vmul.f32 %v2755_v41, %v3513_v6  ;;  %v1441_v50 = vmul.f32 %v3505_v61, %v3513_v6  ;;  %v3523_v4 = vld [vmem:[#allocation7 + $0xa8] sm:$0xff] }
  0xe1   :  { %2054 = vmatmul.mubr.f32.gmra.mrb[30].mxu1 %v3195_v54  ;;  %v3526_v24 = vadd.f32 %v1504_v31, %v1375_v25  ;;  %v1505_v19 = vmul.f32 %v2764_v48, %v1440_v10  ;;  %v1314_v32 = vmul.f32 %v2748_v34, %v3521_v38  ;;  %v1249_v35 = vmul.f32 %v2755_v41, %v3523_v4  ;;  %v3538_v31 = vld [vmem:[#allocation10 + $0xb0] sm:$0xff] }
  0xe2   :  { %4027 = vst [vmem:[#allocation74_spill] sm:$0xff] %v3515_v59  ;;  %2182 = vmatmul.mubr.f32.gmra.mrb[30].mxu0 %v3204_v26  ;;  %2056 = vmatprep.mubr.f32.mxu1 %v3213_v39  ;;  %v1377_v51 = vadd.f32 %v1313_v11, %v1248_v45  ;;  %v1506_v9 = vmul.f32 %v2764_v48, %v1441_v50  ;;  %v3540_v25 = vld [vmem:[#allocation7 + $0xb0] sm:$0xff]  ;;  %v3549_v11 = vld [vmem:[#allocation10 + $0xb8] sm:$0xff] }
  0xe3   :  { %4028 = vst [vmem:[#allocation75_spill] sm:$0xff] %v3526_v24  ;;  %v1442_v54 = vmul.f32 %v3521_v38, %v3523_v4  ;;  %2184 = vmatprep.mubr.f32.mxu0 %v3221_v3  ;;  %v3543_v10 = vadd.f32 %v1505_v19, %v1376_v21  ;;  %v1378_v24 = vadd.f32 %v1314_v32, %v1249_v35  ;;  %v3558_v19 = vld [vmem:[#allocation7 + $0xb8] sm:$0xff]  ;;  %v3560_v21 = vld [vmem:[#allocation10 + $0xc0] sm:$0xff] }
  0xe4   :  { %v1315_v26 = vmul.f32 %v2748_v34, %v3538_v31  ;;  %v1250_v39 = vmul.f32 %v2755_v41, %v3540_v25  ;;  %v3551_v45 = vadd.f32 %v1506_v9, %v1377_v51  ;;  %v1443_v59 = vmul.f32 %v3538_v31, %v3540_v25  ;;  %4031 = vst [vmem:[#allocation78_spill] sm:$0xff] %v3558_v19 }
  0xe5   :  { %4029 = vst [vmem:[#allocation76_spill] sm:$0xff] %v3543_v10  ;;  %v1507_v50 = vmul.f32 %v2764_v48, %v1442_v54  ;;  %v1316_v3 = vmul.f32 %v2748_v34, %v3549_v11  ;;  %2057 = vmatmul.mubr.f32.gmra.mrb[32].mxu1 %v3229_v40  ;;  %v1251_v35 = vmul.f32 %v2755_v41, %v3558_v19  ;;  %v3569_v54 = vld [vmem:[#allocation7 + $0xc0] sm:$0xff] }
  0xe6   :  { %4030 = vst [vmem:[#allocation77_spill] sm:$0xff] %v3551_v45  ;;  %v1379_v32 = vadd.f32 %v1315_v26, %v1250_v39  ;;  %v1444_v51 = vmul.f32 %v3549_v11, %v3558_v19  ;;  %v1317_v9 = vmul.f32 %v2748_v34, %v3560_v21  ;;  %2185 = vmatmul.mubr.f32.gmra.mrb[32].mxu0 %v3231_v49  ;;  %v3578_v39 = vld [vmem:[#allocation10 + $0xc8] sm:$0xff] }
  0xe7   :  { %2059 = vmatprep.mubr.f32.mxu1 %v3246_v43  ;;  %v3573_v45 = vadd.f32 %v1507_v50, %v1378_v24  ;;  %v1508_v40 = vmul.f32 %v2764_v48, %v1443_v59  ;;  %v1252_v26 = vmul.f32 %v2755_v41, %v3569_v54  ;;  %2187 = vmatprep.mubr.f32.mxu0 %v3248_v30  ;;  %v3586_v43 = vld [vmem:[#allocation7 + $0xc8] sm:$0xff] }
  0xe8   :  { %v1380_v10 = vadd.f32 %v1316_v3, %v1251_v35  ;;  %v1509_v15 = vmul.f32 %v2764_v48, %v1444_v51  ;;  %v1445_v19 = vmul.f32 %v3560_v21, %v3569_v54  ;;  %v1318_v49 = vmul.f32 %v2748_v34, %v3578_v39  ;;  %v3594_v3 = vld [vmem:[#allocation10 + $0xd0] sm:$0xff] }
  0xe9   :  { %4032 = vst [vmem:[#allocation79_spill] sm:$0xff] %v3573_v45  ;;  %v3588_v24 = vadd.f32 %v1508_v40, %v1379_v32  ;;  %v1381_v59 = vadd.f32 %v1317_v9, %v1252_v26  ;;  %v1253_v50 = vmul.f32 %v2755_v41, %v3586_v43  ;;  %v1446_v30 = vmul.f32 %v3578_v39, %v3586_v43  ;;  %v3596_v35 = vld [vmem:[#allocation7 + $0xd0] sm:$0xff] }
  0xea   :  { %2060 = vmatmul.mubr.f32.gmra.mrb[34].mxu1 %v3257_v2  ;;  %v3599_v51 = vadd.f32 %v1509_v15, %v1380_v10  ;;  %v1510_v45 = vmul.f32 %v2764_v48, %v1445_v19  ;;  %v1319_v32 = vmul.f32 %v2748_v34, %v3594_v3  ;;  %v1254_v9 = vmul.f32 %v2755_v41, %v3596_v35  ;;  %v3611_v15 = vld [vmem:[#allocation10 + $0xd8] sm:$0xff] }
  0xeb   :  { %4033 = vst [vmem:[#allocation80_spill] sm:$0xff] %v3588_v24  ;;  %2188 = vmatmul.mubr.f32.gmra.mrb[34].mxu0 %v3266_v57  ;;  %2062 = vmatprep.mubr.f32.mxu1 %v3268_v23  ;;  %v1382_v40 = vadd.f32 %v1318_v49, %v1253_v50  ;;  %v1511_v26 = vmul.f32 %v2764_v48, %v1446_v30  ;;  %v3613_v10 = vld [vmem:[#allocation7 + $0xd8] sm:$0xff]  ;;  %v3622_v49 = vld [vmem:[#allocation10 + $0xe0] sm:$0xff] }
  0xec   :  { %4034 = vst [vmem:[#allocation81_spill] sm:$0xff] %v3599_v51  ;;  %v1447_v2 = vmul.f32 %v3594_v3, %v3596_v35  ;;  %2190 = vmatprep.mubr.f32.mxu0 %v3277_v22  ;;  %v3616_v19 = vadd.f32 %v1510_v45, %v1381_v59  ;;  %v1383_v24 = vadd.f32 %v1319_v32, %v1254_v9  ;;  %4036 = vst [vmem:[#allocation83_spill] sm:$0xff] %v3622_v49  ;;  %v3631_v45 = vld [vmem:[#allocation7 + $0xe0] sm:$0xff]  ;;  %v3633_v59 = vld [vmem:[#allocation10 + $0xe8] sm:$0xff] }
  0xed   :  { %v1320_v57 = vmul.f32 %v2748_v34, %v3611_v15  ;;  %v1255_v23 = vmul.f32 %v2755_v41, %v3613_v10  ;;  %v3624_v50 = vadd.f32 %v1511_v26, %v1382_v40  ;;  %v1448_v51 = vmul.f32 %v3611_v15, %v3613_v10  ;;  %4038 = vst [vmem:[#allocation85_spill] sm:$0xff] %v3631_v45 }
  0xee   :  { %4035 = vst [vmem:[#allocation82_spill] sm:$0xff] %v3616_v19  ;;  %v1512_v30 = vmul.f32 %v2764_v48, %v1447_v2  ;;  %v1321_v22 = vmul.f32 %v2748_v34, %v3622_v49  ;;  %2063 = vmatmul.mubr.f32.gmra.mrb[36].mxu1 %v3286_v52  ;;  %v1256_v9 = vmul.f32 %v2755_v41, %v3631_v45  ;;  %v3642_v2 = vld [vmem:[#allocation7 + $0xe8] sm:$0xff] }
  0xef   :  { %4037 = vst [vmem:[#allocation84_spill] sm:$0xff] %v3624_v50  ;;  %v1384_v32 = vadd.f32 %v1320_v57, %v1255_v23  ;;  %v1449_v40 = vmul.f32 %v3622_v49, %v3631_v45  ;;  %v1322_v26 = vmul.f32 %v2748_v34, %v3633_v59  ;;  %4039 = vst [vmem:[#allocation86_spill] sm:$0xff] %v3642_v2  ;;  %2191 = vmatmul.mubr.f32.gmra.mrb[36].mxu0 %v3294_v20  ;;  %v3651_v23 = vld [vmem:[#allocation10 + $0xf0] sm:$0xff] }
  0xf0   :  { %2065 = vmatprep.mubr.f32.mxu1 %v3302_v1  ;;  %v3646_v19 = vadd.f32 %v1512_v30, %v1383_v24  ;;  %v1513_v52 = vmul.f32 %v2764_v48, %v1448_v51  ;;  %v1257_v57 = vmul.f32 %v2755_v41, %v3642_v2  ;;  %2193 = vmatprep.mubr.f32.mxu0 %v3304_v36  ;;  %v3659_v1 = vld [vmem:[#allocation7 + $0xf0] sm:$0xff] }
  0xf1   :  { %v1385_v50 = vadd.f32 %v1321_v22, %v1256_v9  ;;  %v1514_v45 = vmul.f32 %v2764_v48, %v1449_v40  ;;  %v1450_v49 = vmul.f32 %v3633_v59, %v3642_v2  ;;  %v1323_v20 = vmul.f32 %v2748_v34, %v3651_v23  ;;  %v257_v22 = vld [vmem:[#allocation10 + $0xf8] sm:$0xff] }
  0xf2   :  { %4040 = vst [vmem:[#allocation87_spill] sm:$0xff] %v3646_v19  ;;  %v3661_v24 = vadd.f32 %v1513_v52, %v1384_v32  ;;  %v1386_v51 = vadd.f32 %v1322_v26, %v1257_v57  ;;  %v1258_v30 = vmul.f32 %v2755_v41, %v3659_v1  ;;  %v1451_v36 = vmul.f32 %v3651_v23, %v3659_v1  ;;  %v193_v9 = vld [vmem:[#allocation7 + $0xf8] sm:$0xff] }
  0xf3   :  { %2066 = vmatmul.mubr.f32.gmra.mrb[38].mxu1 %v3319_v47  ;;  %v3668_v40 = vadd.f32 %v1514_v45, %v1385_v50  ;;  %v1515_v19 = vmul.f32 %v2764_v48, %v1450_v49  ;;  %v1324_v2 = vmul.f32 %v2748_v34, %v257_v22  ;;  %v1259_v32 = vmul.f32 %v2755_v41, %v193_v9  ;;  %v4042_v41 = vld [vmem:[#allocation78_spill] sm:$0xff] }
  0xf4   :  { %4041 = vst [vmem:[#allocation88_spill] sm:$0xff] %v3661_v24  ;;  %2194 = vmatmul.mubr.f32.gmra.mrb[38].mxu0 %v3321_v28  ;;  %2068 = vmatprep.mubr.f32.mxu1 %v3330_v12  ;;  %v1387_v26 = vadd.f32 %v1323_v20, %v1258_v30  ;;  %v1516_v52 = vmul.f32 %v2764_v48, %v1451_v36  ;;  %v4044_v28 = vld [vmem:[#allocation85_spill] sm:$0xff]  ;;  %v4049_v30 = vld [vmem:[#allocation27_spill] sm:$0xff] }
  0xf5   :  { %v1452_v57 = vmul.f32 %v257_v22, %v193_v9  ;;  %2196 = vmatprep.mubr.f32.mxu0 %v3339_v16  ;;  %v3677_v24 = vadd.f32 %v1515_v19, %v1386_v51  ;;  %v1388_v47 = vadd.f32 %v1324_v2, %v1259_v32  ;;  %v4048_v2 = vld [vmem:[#allocation28_spill] sm:$0xff] }
  0xf6   :  { %v3679_v50 = vadd.f32 %v1516_v52, %v1387_v26  ;;  %v4045_v12 = vld [vmem:[#allocation86_spill] sm:$0xff] }
  0xf7   :  { %v1517_v49 = vmul.f32 %v2764_v48, %v1452_v57  ;;  %2069 = vmatmul.mubr.f32.gmra.mrb[40].mxu1 %v3341_v42  ;;  %v4043_v48 = vld [vmem:[#allocation83_spill] sm:$0xff] }
  0xf8   :  { %2197 = vmatmul.mubr.f32.gmra.mrb[40].mxu0 %v3350_v60  ;;  %2071 = vmatprep.mubr.f32.mxu1 %v3359_v8  ;;  %v3731_v60 = vld [vmem:[%s3971_s7] ss:$0 sm:$0xff]  ;;  %s2580_s7 = smov [#allocation15]  }
  0xf9   :  { %v3685_v34 = vadd.f32 %v1517_v49, %v1388_v47  ;;  %2199 = vmatprep.mubr.f32.mxu0 %v3367_v5  ;;  %s1780_s30 = sshll.u32 %s2580_s7, 4  ;;  %s3833_s30 = int_to_ptr.vmem [resolvable:$true] %s1780_s30 }
  0xfa   :  { %s2513_s11 = scalar_lea.vmem %s3833_s30, 4096  ;;  %p2518_p10 = scmp.lt.s32.totalorder %s3833_s30, %s3833_s30 }
  0xfb   :  { %2072 = vmatmul.mubr.f32.gmra.mrb[42].mxu1 %v3375_v63  ;;  %p2514_p9 = scmp.ne.s32.totalorder %s3833_s30, %s2513_s11  ;;  %p2519_p11 = scmp.lt.s32.totalorder %s2513_s11, %s2513_s11 }
  0xfc   :  { %2200 = vmatmul.mubr.f32.gmra.mrb[42].mxu0 %v3377_v27  ;;  %2074 = vmatprep.mubr.f32.mxu1 %v3392_v17 }
  0xfd   :  { %2202 = vmatprep.mubr.f32.mxu0 %v3394_v13  ;;  %p2520_p12 = por %p2519_p11, %p2518_p10 }
  0xff   :  { %2075 = vmatmul.mubr.f32.gmra.mrb[44].mxu1 %v3403_v44  ;;  %v3734_v44 = vstv %s1814_s26  ;;  %p2521_p13 = pnand %p2520_p12, %p2514_p9 }
 0x100   :  { %2203 = vmatmul.mubr.f32.gmra.mrb[44].mxu0 %v3412_v7  ;;  %2077 = vmatprep.mubr.f32.mxu1 %v3414_v56 }
 0x101   :  { %2205 = vmatprep.mubr.f32.mxu0 %v3423_v18 }
 0x103   :  { %2078 = vmatmul.mubr.f32.gmra.mrb[46].mxu1 %v3432_v0 }
 0x104   :  { %2206 = vmatmul.mubr.f32.gmra.mrb[46].mxu0 %v3440_v58  ;;  %2080 = vmatprep.mubr.f32.mxu1 %v3448_v14 }
 0x105   :  { %2208 = vmatprep.mubr.f32.mxu0 %v3450_v29 }
 0x107   :  { %2081 = vmatmul.mubr.f32.gmra.mrb[48].mxu1 %v3465_v55 }
 0x108   :  { %2209 = vmatmul.mubr.f32.gmra.mrb[48].mxu0 %v3467_v46  ;;  %2083 = vmatprep.mubr.f32.mxu1 %v3476_v37 }
 0x109   :  { %2211 = vmatprep.mubr.f32.mxu0 %v3485_v33 }
 0x10b   :  { %2084 = vmatmul.mubr.f32.gmra.mrb[50].mxu1 %v3487_v62 }
 0x10c   :  { %2212 = vmatmul.mubr.f32.gmra.mrb[50].mxu0 %v3496_v53  ;;  %2086 = vmatprep.mubr.f32.mxu1 %v3505_v61 }
 0x10d   :  { %2214 = vmatprep.mubr.f32.mxu0 %v3513_v6 }
 0x10f   :  { %2087 = vmatmul.mubr.f32.gmra.mrb[52].mxu1 %v3521_v38  ;;  %v4046_v38 = vld [vmem:[#allocation26_spill] sm:$0xff] }
 0x110   :  { %2215 = vmatmul.mubr.f32.gmra.mrb[52].mxu0 %v3523_v4  ;;  %2089 = vmatprep.mubr.f32.mxu1 %v3538_v31 }
 0x111   :  { %2217 = vmatprep.mubr.f32.mxu0 %v3540_v25 }
 0x113   :  { %2090 = vmatmul.mubr.f32.gmra.mrb[54].mxu1 %v3549_v11 }
 0x114   :  { %2218 = vmatmul.mubr.f32.gmra.mrb[54].mxu0 %v4042_v41  ;;  %2092 = vmatprep.mubr.f32.mxu1 %v3560_v21  ;;  %v4047_v21 = vld [vmem:[#allocation25_spill] sm:$0xff] }
 0x115   :  { %2220 = vmatprep.mubr.f32.mxu0 %v3569_v54 }
 0x117   :  { %2093 = vmatmul.mubr.f32.gmra.mrb[56].mxu1 %v3578_v39 }
 0x118   :  { %2221 = vmatmul.mubr.f32.gmra.mrb[56].mxu0 %v3586_v43  ;;  %2095 = vmatprep.mubr.f32.mxu1 %v3594_v3 }
 0x119   :  { %2223 = vmatprep.mubr.f32.mxu0 %v3596_v35 }
 0x11b   :  { %2096 = vmatmul.mubr.f32.gmra.mrb[58].mxu1 %v3611_v15 }
 0x11c   :  { %2224 = vmatmul.mubr.f32.gmra.mrb[58].mxu0 %v3613_v10  ;;  %2098 = vmatprep.mubr.f32.mxu1 %v4043_v48  ;;  %v4050_v48 = vld [vmem:[#allocation30_spill] sm:$0xff] }
 0x11d   :  { %2226 = vmatprep.mubr.f32.mxu0 %v4044_v28 }
 0x11f   :  { %2099 = vmatmul.mubr.f32.gmra.mrb[60].mxu1 %v3633_v59 }
 0x120   :  { %2227 = vmatmul.mubr.f32.gmra.mrb[60].mxu0 %v4045_v12  ;;  %2101 = vmatprep.mubr.f32.mxu1 %v3651_v23 }
 0x121   :  { %2229 = vmatprep.mubr.f32.mxu0 %v3659_v1 }
 0x123   :  { %2102 = vmatmul.mubr.f32.gmra.mrb[62].mxu1 %v257_v22 }
 0x124   :  { %2230 = vmatmul.mubr.f32.gmra.mrb[62].mxu0 %v193_v9 }
 0x170   :  { %v2010_v16 = vpop.f32.mrb[0].mxu1 }
 0x171   :  { %v356_v8 = vpop.f32.mrb[1].mxu1 }
 0x172   :  { %v2138_v42 = vpop.f32.mrb[0].mxu0 }
 0x173   :  { %v747_v5 = vadd.f32 %v2138_v42, %v2010_v16  ;;  %v741_v63 = vpop.f32.mrb[1].mxu0 }
 0x174   :  { %v742_v27 = vadd.f32 %v741_v63, %v356_v8  ;;  %v4051_v8 = vld [vmem:[#allocation29_spill] sm:$0xff] }
 0x175   :  { %v1068_v17 = vadd.f32 %v3731_v60, %v747_v5  ;;  %v2013_v13 = vpop.f32.mrb[2].mxu1 }
 0x176   :  { %v1067_v7 = vadd.f32 %v3731_v60, %v742_v27  ;;  %v2141_v56 = vpop.f32.mrb[2].mxu0  ;;  %v366_v18 = vpop.f32.mrb[3].mxu1 }
 0x177   :  { %v1132_v0 = vmax.f32 %v1068_v17, 0.0  ;;  %v757_v58 = vadd.f32 %v2141_v56, %v2013_v13  ;;  %v751_v14 = vpop.f32.mrb[3].mxu0 }
 0x178   :  { %v1131_v29 = vmax.f32 %v1067_v7, 0.0  ;;  %v752_v55 = vadd.f32 %v751_v14, %v366_v18  ;;  %v4052_v14 = vld [vmem:[#allocation32_spill] sm:$0xff] }
 0x179   :  { %v1584_v46 = vmul.f32 %v3734_v44, %v1132_v0  ;;  %v1070_v37 = vadd.f32 %v3731_v60, %v757_v58  ;;  %v2016_v33 = vpop.f32.mrb[4].mxu1 }
 0x17a   :  { %v1583_v62 = vmul.f32 %v3734_v44, %v1131_v29  ;;  %v1069_v53 = vadd.f32 %v3731_v60, %v752_v55  ;;  %v2144_v61 = vpop.f32.mrb[4].mxu0  ;;  %v376_v6 = vpop.f32.mrb[5].mxu1 }
 0x17b   :  { %v1648_v4 = vadd.f32 %v1584_v46, %v4046_v38  ;;  %v1134_v31 = vmax.f32 %v1070_v37, 0.0  ;;  %v767_v25 = vadd.f32 %v2144_v61, %v2016_v33  ;;  %v761_v11 = vpop.f32.mrb[5].mxu0  ;;  %v4053_v33 = vld [vmem:[#allocation31_spill] sm:$0xff] }
 0x17c   :  { %v1647_v54 = vadd.f32 %v1583_v62, %v4047_v21  ;;  %v1133_v39 = vmax.f32 %v1069_v53, 0.0  ;;  %v762_v43 = vadd.f32 %v761_v11, %v376_v6 }
 0x17d   :  { %1712 = vst [vmem:[#allocation15 + $0x8] sm:$0xff] %v1648_v4  ;;  %v1586_v3 = vmul.f32 %v3734_v44, %v1134_v31  ;;  %v1072_v35 = vadd.f32 %v3731_v60, %v767_v25 }
 0x17e   :  { %v2019_v15 = vpop.f32.mrb[6].mxu1  ;;  %1711 = vst [vmem:[#allocation15] sm:$0xff] %v1647_v54  ;;  %v1585_v10 = vmul.f32 %v3734_v44, %v1133_v39  ;;  %v1071_v19 = vadd.f32 %v3731_v60, %v762_v43  ;;  %v4054_v54 = vld [vmem:[#allocation34_spill] sm:$0xff] }
 0x17f   :  { %v2147_v45 = vpop.f32.mrb[6].mxu0  ;;  %v386_v59 = vpop.f32.mrb[7].mxu1  ;;  %v1650_v23 = vadd.f32 %v1586_v3, %v4048_v2  ;;  %v1136_v20 = vmax.f32 %v1072_v35, 0.0 }
 0x180   :  { %v777_v1 = vadd.f32 %v2147_v45, %v2019_v15  ;;  %v771_v51 = vpop.f32.mrb[7].mxu0  ;;  %v1649_v36 = vadd.f32 %v1585_v10, %v4049_v30  ;;  %v1135_v22 = vmax.f32 %v1071_v19, 0.0  ;;  %v4055_v15 = vld [vmem:[#allocation33_spill] sm:$0xff] }
 0x181   :  { %v772_v9 = vadd.f32 %v771_v51, %v386_v59  ;;  %1714 = vst [vmem:[#allocation15 + $0x18] sm:$0xff] %v1650_v23  ;;  %v1588_v32 = vmul.f32 %v3734_v44, %v1136_v20 }
 0x182   :  { %v1074_v26 = vadd.f32 %v3731_v60, %v777_v1  ;;  %v2022_v52 = vpop.f32.mrb[8].mxu1  ;;  %1713 = vst [vmem:[#allocation15 + $0x10] sm:$0xff] %v1649_v36  ;;  %v1587_v57 = vmul.f32 %v3734_v44, %v1135_v22  ;;  %v4056_v36 = vld [vmem:[#allocation36_spill] sm:$0xff] }
 0x183   :  { %v1073_v47 = vadd.f32 %v3731_v60, %v772_v9  ;;  %v2150_v49 = vpop.f32.mrb[8].mxu0  ;;  %v396_v41 = vpop.f32.mrb[9].mxu1  ;;  %v1652_v28 = vadd.f32 %v1588_v32, %v4050_v48 }
 0x184   :  { %v1138_v12 = vmax.f32 %v1074_v26, 0.0  ;;  %v787_v16 = vadd.f32 %v2150_v49, %v2022_v52  ;;  %v781_v42 = vpop.f32.mrb[9].mxu0  ;;  %v1651_v5 = vadd.f32 %v1587_v57, %v4051_v8  ;;  %v4057_v52 = vld [vmem:[#allocation35_spill] sm:$0xff] }
 0x185   :  { %v1137_v63 = vmax.f32 %v1073_v47, 0.0  ;;  %v782_v27 = vadd.f32 %v781_v42, %v396_v41  ;;  %1716 = vst [vmem:[#allocation15 + $0x28] sm:$0xff] %v1652_v28 }
 0x186   :  { %v1590_v17 = vmul.f32 %v3734_v44, %v1138_v12  ;;  %v1076_v13 = vadd.f32 %v3731_v60, %v787_v16  ;;  %1715 = vst [vmem:[#allocation15 + $0x20] sm:$0xff] %v1651_v5  ;;  %v4058_v5 = vld [vmem:[#allocation38_spill] sm:$0xff] }
 0x187   :  { %v2025_v7 = vpop.f32.mrb[10].mxu1  ;;  %v1589_v56 = vmul.f32 %v3734_v44, %v1137_v63  ;;  %v1075_v18 = vadd.f32 %v3731_v60, %v782_v27 }
 0x188   :  { %v2153_v0 = vpop.f32.mrb[10].mxu0  ;;  %v406_v58 = vpop.f32.mrb[11].mxu1  ;;  %v1654_v29 = vadd.f32 %v1590_v17, %v4052_v14  ;;  %v1140_v55 = vmax.f32 %v1076_v13, 0.0 }
 0x189   :  { %v797_v46 = vadd.f32 %v2153_v0, %v2025_v7  ;;  %v791_v37 = vpop.f32.mrb[11].mxu0  ;;  %v1653_v62 = vadd.f32 %v1589_v56, %v4053_v33  ;;  %v1139_v53 = vmax.f32 %v1075_v18, 0.0  ;;  %v4059_v7 = vld [vmem:[#allocation37_spill] sm:$0xff] }
 0x18a   :  { %v792_v61 = vadd.f32 %v791_v37, %v406_v58  ;;  %1718 = vst [vmem:[#allocation15 + $0x38] sm:$0xff] %v1654_v29  ;;  %v1592_v6 = vmul.f32 %v3734_v44, %v1140_v55 }
 0x18b   :  { %v1078_v38 = vadd.f32 %v3731_v60, %v797_v46  ;;  %v2028_v4 = vpop.f32.mrb[12].mxu1  ;;  %1717 = vst [vmem:[#allocation15 + $0x30] sm:$0xff] %v1653_v62  ;;  %v1591_v31 = vmul.f32 %v3734_v44, %v1139_v53  ;;  %v4060_v62 = vld [vmem:[#allocation40_spill] sm:$0xff] }
 0x18c   :  { %v1077_v25 = vadd.f32 %v3731_v60, %v792_v61  ;;  %v2156_v11 = vpop.f32.mrb[12].mxu0  ;;  %v416_v21 = vpop.f32.mrb[13].mxu1  ;;  %v1656_v39 = vadd.f32 %v1592_v6, %v4054_v54 }
 0x18d   :  { %v1142_v43 = vmax.f32 %v1078_v38, 0.0  ;;  %v807_v3 = vadd.f32 %v2156_v11, %v2028_v4  ;;  %v801_v35 = vpop.f32.mrb[13].mxu0  ;;  %v1655_v10 = vadd.f32 %v1591_v31, %v4055_v15  ;;  %v4061_v4 = vld [vmem:[#allocation39_spill] sm:$0xff] }
 0x18e   :  { %v1141_v19 = vmax.f32 %v1077_v25, 0.0  ;;  %v802_v45 = vadd.f32 %v801_v35, %v416_v21  ;;  %1720 = vst [vmem:[#allocation15 + $0x48] sm:$0xff] %v1656_v39 }
 0x18f   :  { %v1594_v59 = vmul.f32 %v3734_v44, %v1142_v43  ;;  %v1080_v2 = vadd.f32 %v3731_v60, %v807_v3  ;;  %1719 = vst [vmem:[#allocation15 + $0x40] sm:$0xff] %v1655_v10  ;;  %v4062_v10 = vld [vmem:[#allocation42_spill] sm:$0xff] }
 0x190   :  { %v2031_v23 = vpop.f32.mrb[14].mxu1  ;;  %v1593_v20 = vmul.f32 %v3734_v44, %v1141_v19  ;;  %v1079_v1 = vadd.f32 %v3731_v60, %v802_v45 }
 0x191   :  { %v2159_v51 = vpop.f32.mrb[14].mxu0  ;;  %v426_v30 = vpop.f32.mrb[15].mxu1  ;;  %v1658_v22 = vadd.f32 %v1594_v59, %v4056_v36  ;;  %v1144_v9 = vmax.f32 %v1080_v2, 0.0 }
 0x192   :  { %v817_v32 = vadd.f32 %v2159_v51, %v2031_v23  ;;  %v811_v26 = vpop.f32.mrb[15].mxu0  ;;  %v1657_v57 = vadd.f32 %v1593_v20, %v4057_v52  ;;  %v1143_v47 = vmax.f32 %v1079_v1, 0.0  ;;  %v4063_v23 = vld [vmem:[#allocation41_spill] sm:$0xff] }
 0x193   :  { %v812_v49 = vadd.f32 %v811_v26, %v426_v30  ;;  %1722 = vst [vmem:[#allocation15 + $0x58] sm:$0xff] %v1658_v22  ;;  %v1596_v41 = vmul.f32 %v3734_v44, %v1144_v9 }
 0x194   :  { %v1082_v48 = vadd.f32 %v3731_v60, %v817_v32  ;;  %v2034_v28 = vpop.f32.mrb[16].mxu1  ;;  %1721 = vst [vmem:[#allocation15 + $0x50] sm:$0xff] %v1657_v57  ;;  %v1595_v12 = vmul.f32 %v3734_v44, %v1143_v47  ;;  %v4064_v57 = vld [vmem:[#allocation44_spill] sm:$0xff] }
 0x195   :  { %v1081_v16 = vadd.f32 %v3731_v60, %v812_v49  ;;  %v2162_v42 = vpop.f32.mrb[16].mxu0  ;;  %v436_v8 = vpop.f32.mrb[17].mxu1  ;;  %v1660_v63 = vadd.f32 %v1596_v41, %v4058_v5 }
 0x196   :  { %v1146_v27 = vmax.f32 %v1082_v48, 0.0  ;;  %v827_v17 = vadd.f32 %v2162_v42, %v2034_v28  ;;  %v821_v13 = vpop.f32.mrb[17].mxu0  ;;  %v1659_v56 = vadd.f32 %v1595_v12, %v4059_v7  ;;  %v4065_v28 = vld [vmem:[#allocation43_spill] sm:$0xff] }
 0x197   :  { %v1145_v18 = vmax.f32 %v1081_v16, 0.0  ;;  %v822_v0 = vadd.f32 %v821_v13, %v436_v8  ;;  %1724 = vst [vmem:[#allocation15 + $0x68] sm:$0xff] %v1660_v63 }
 0x198   :  { %v1598_v58 = vmul.f32 %v3734_v44, %v1146_v27  ;;  %v1084_v14 = vadd.f32 %v3731_v60, %v827_v17  ;;  %1723 = vst [vmem:[#allocation15 + $0x60] sm:$0xff] %v1659_v56  ;;  %v4066_v56 = vld [vmem:[#allocation46_spill] sm:$0xff] }
 0x199   :  { %v2037_v29 = vpop.f32.mrb[18].mxu1  ;;  %v1597_v55 = vmul.f32 %v3734_v44, %v1145_v18  ;;  %v1083_v46 = vadd.f32 %v3731_v60, %v822_v0 }
 0x19a   :  { %v2165_v37 = vpop.f32.mrb[18].mxu0  ;;  %v446_v33 = vpop.f32.mrb[19].mxu1  ;;  %v1662_v53 = vadd.f32 %v1598_v58, %v4060_v62  ;;  %v1148_v61 = vmax.f32 %v1084_v14, 0.0 }
 0x19b   :  { %v837_v6 = vadd.f32 %v2165_v37, %v2037_v29  ;;  %v831_v38 = vpop.f32.mrb[19].mxu0  ;;  %v1661_v31 = vadd.f32 %v1597_v55, %v4061_v4  ;;  %v1147_v25 = vmax.f32 %v1083_v46, 0.0  ;;  %v4067_v29 = vld [vmem:[#allocation45_spill] sm:$0xff] }
 0x19c   :  { %v832_v11 = vadd.f32 %v831_v38, %v446_v33  ;;  %1726 = vst [vmem:[#allocation15 + $0x78] sm:$0xff] %v1662_v53  ;;  %v1600_v21 = vmul.f32 %v3734_v44, %v1148_v61 }
 0x19d   :  { %v1086_v54 = vadd.f32 %v3731_v60, %v837_v6  ;;  %v2040_v39 = vpop.f32.mrb[20].mxu1  ;;  %1725 = vst [vmem:[#allocation15 + $0x70] sm:$0xff] %v1661_v31  ;;  %v1599_v43 = vmul.f32 %v3734_v44, %v1147_v25  ;;  %v4068_v31 = vld [vmem:[#allocation48_spill] sm:$0xff] }
 0x19e   :  { %v1085_v3 = vadd.f32 %v3731_v60, %v832_v11  ;;  %v2168_v35 = vpop.f32.mrb[20].mxu0  ;;  %v456_v15 = vpop.f32.mrb[21].mxu1  ;;  %v1664_v19 = vadd.f32 %v1600_v21, %v4062_v10 }
 0x19f   :  { %v1150_v45 = vmax.f32 %v1086_v54, 0.0  ;;  %v847_v59 = vadd.f32 %v2168_v35, %v2040_v39  ;;  %v841_v2 = vpop.f32.mrb[21].mxu0  ;;  %v1663_v20 = vadd.f32 %v1599_v43, %v4063_v23  ;;  %v4069_v39 = vld [vmem:[#allocation47_spill] sm:$0xff] }
 0x1a0   :  { %v1149_v1 = vmax.f32 %v1085_v3, 0.0  ;;  %v842_v51 = vadd.f32 %v841_v2, %v456_v15  ;;  %1728 = vst [vmem:[#allocation15 + $0x88] sm:$0xff] %v1664_v19 }
 0x1a1   :  { %v1602_v30 = vmul.f32 %v3734_v44, %v1150_v45  ;;  %v1088_v36 = vadd.f32 %v3731_v60, %v847_v59  ;;  %1727 = vst [vmem:[#allocation15 + $0x80] sm:$0xff] %v1663_v20  ;;  %v4070_v20 = vld [vmem:[#allocation50_spill] sm:$0xff] }
 0x1a2   :  { %v2043_v22 = vpop.f32.mrb[22].mxu1  ;;  %v1601_v9 = vmul.f32 %v3734_v44, %v1149_v1  ;;  %v1087_v32 = vadd.f32 %v3731_v60, %v842_v51 }
 0x1a3   :  { %v2171_v26 = vpop.f32.mrb[22].mxu0  ;;  %v466_v52 = vpop.f32.mrb[23].mxu1  ;;  %v1666_v47 = vadd.f32 %v1602_v30, %v4064_v57  ;;  %v1152_v49 = vmax.f32 %v1088_v36, 0.0 }
 0x1a4   :  { %v857_v41 = vadd.f32 %v2171_v26, %v2043_v22  ;;  %v851_v48 = vpop.f32.mrb[23].mxu0  ;;  %v1665_v12 = vadd.f32 %v1601_v9, %v4065_v28  ;;  %v1151_v16 = vmax.f32 %v1087_v32, 0.0  ;;  %v4071_v22 = vld [vmem:[#allocation49_spill] sm:$0xff] }
 0x1a5   :  { %v852_v42 = vadd.f32 %v851_v48, %v466_v52  ;;  %1730 = vst [vmem:[#allocation15 + $0x98] sm:$0xff] %v1666_v47  ;;  %v1604_v8 = vmul.f32 %v3734_v44, %v1152_v49 }
 0x1a6   :  { %v1090_v5 = vadd.f32 %v3731_v60, %v857_v41  ;;  %v2046_v63 = vpop.f32.mrb[24].mxu1  ;;  %1729 = vst [vmem:[#allocation15 + $0x90] sm:$0xff] %v1665_v12  ;;  %v1603_v27 = vmul.f32 %v3734_v44, %v1151_v16  ;;  %v4072_v12 = vld [vmem:[#allocation52_spill] sm:$0xff] }
 0x1a7   :  { %v1089_v17 = vadd.f32 %v3731_v60, %v852_v42  ;;  %v2174_v13 = vpop.f32.mrb[24].mxu0  ;;  %v476_v7 = vpop.f32.mrb[25].mxu1  ;;  %v1668_v18 = vadd.f32 %v1604_v8, %v4066_v56 }
 0x1a8   :  { %v1154_v0 = vmax.f32 %v1090_v5, 0.0  ;;  %v867_v58 = vadd.f32 %v2174_v13, %v2046_v63  ;;  %v861_v14 = vpop.f32.mrb[25].mxu0  ;;  %v1667_v55 = vadd.f32 %v1603_v27, %v4067_v29  ;;  %v4073_v63 = vld [vmem:[#allocation51_spill] sm:$0xff] }
 0x1a9   :  { %v1153_v46 = vmax.f32 %v1089_v17, 0.0  ;;  %v862_v37 = vadd.f32 %v861_v14, %v476_v7  ;;  %1732 = vst [vmem:[#allocation15 + $0xa8] sm:$0xff] %v1668_v18 }
 0x1aa   :  { %v1606_v33 = vmul.f32 %v3734_v44, %v1154_v0  ;;  %v1092_v62 = vadd.f32 %v3731_v60, %v867_v58  ;;  %1731 = vst [vmem:[#allocation15 + $0xa0] sm:$0xff] %v1667_v55  ;;  %v4074_v55 = vld [vmem:[#allocation54_spill] sm:$0xff] }
 0x1ab   :  { %v2049_v53 = vpop.f32.mrb[26].mxu1  ;;  %v1605_v61 = vmul.f32 %v3734_v44, %v1153_v46  ;;  %v1091_v6 = vadd.f32 %v3731_v60, %v862_v37 }
 0x1ac   :  { %v2177_v38 = vpop.f32.mrb[26].mxu0  ;;  %v486_v4 = vpop.f32.mrb[27].mxu1  ;;  %v1670_v25 = vadd.f32 %v1606_v33, %v4068_v31  ;;  %v1156_v11 = vmax.f32 %v1092_v62, 0.0 }
 0x1ad   :  { %v877_v21 = vadd.f32 %v2177_v38, %v2049_v53  ;;  %v871_v54 = vpop.f32.mrb[27].mxu0  ;;  %v1669_v43 = vadd.f32 %v1605_v61, %v4069_v39  ;;  %v1155_v3 = vmax.f32 %v1091_v6, 0.0  ;;  %v4075_v53 = vld [vmem:[#allocation53_spill] sm:$0xff] }
 0x1ae   :  { %v872_v35 = vadd.f32 %v871_v54, %v486_v4  ;;  %1734 = vst [vmem:[#allocation15 + $0xb8] sm:$0xff] %v1670_v25  ;;  %v1608_v15 = vmul.f32 %v3734_v44, %v1156_v11 }
 0x1af   :  { %v1094_v10 = vadd.f32 %v3731_v60, %v877_v21  ;;  %v2052_v19 = vpop.f32.mrb[28].mxu1  ;;  %1733 = vst [vmem:[#allocation15 + $0xb0] sm:$0xff] %v1669_v43  ;;  %v1607_v45 = vmul.f32 %v3734_v44, %v1155_v3  ;;  %v4076_v43 = vld [vmem:[#allocation56_spill] sm:$0xff] }
 0x1b0   :  { %v1093_v59 = vadd.f32 %v3731_v60, %v872_v35  ;;  %v2180_v2 = vpop.f32.mrb[28].mxu0  ;;  %v496_v23 = vpop.f32.mrb[29].mxu1  ;;  %v1672_v1 = vadd.f32 %v1608_v15, %v4070_v20 }
 0x1b1   :  { %v1158_v51 = vmax.f32 %v1094_v10, 0.0  ;;  %v887_v30 = vadd.f32 %v2180_v2, %v2052_v19  ;;  %v881_v36 = vpop.f32.mrb[29].mxu0  ;;  %v1671_v9 = vadd.f32 %v1607_v45, %v4071_v22  ;;  %v4077_v19 = vld [vmem:[#allocation55_spill] sm:$0xff] }
 0x1b2   :  { %v1157_v32 = vmax.f32 %v1093_v59, 0.0  ;;  %v882_v26 = vadd.f32 %v881_v36, %v496_v23  ;;  %1736 = vst [vmem:[#allocation15 + $0xc8] sm:$0xff] %v1672_v1 }
 0x1b3   :  { %v1610_v52 = vmul.f32 %v3734_v44, %v1158_v51  ;;  %v1096_v57 = vadd.f32 %v3731_v60, %v887_v30  ;;  %1735 = vst [vmem:[#allocation15 + $0xc0] sm:$0xff] %v1671_v9  ;;  %v4078_v9 = vld [vmem:[#allocation58_spill] sm:$0xff] }
 0x1b4   :  { %v2055_v47 = vpop.f32.mrb[30].mxu1  ;;  %v1609_v49 = vmul.f32 %v3734_v44, %v1157_v32  ;;  %v1095_v41 = vadd.f32 %v3731_v60, %v882_v26 }
 0x1b5   :  { %v2183_v48 = vpop.f32.mrb[30].mxu0  ;;  %v506_v28 = vpop.f32.mrb[31].mxu1  ;;  %v1674_v16 = vadd.f32 %v1610_v52, %v4072_v12  ;;  %v1160_v42 = vmax.f32 %v1096_v57, 0.0 }
 0x1b6   :  { %v897_v8 = vadd.f32 %v2183_v48, %v2055_v47  ;;  %v891_v5 = vpop.f32.mrb[31].mxu0  ;;  %v1673_v27 = vadd.f32 %v1609_v49, %v4073_v63  ;;  %v1159_v17 = vmax.f32 %v1095_v41, 0.0 }
 0x1b7   :  { %v892_v13 = vadd.f32 %v891_v5, %v506_v28  ;;  %1738 = vst [vmem:[#allocation15 + $0xd8] sm:$0xff] %v1674_v16  ;;  %v1612_v7 = vmul.f32 %v3734_v44, %v1160_v42 }
 0x1b8   :  { %v1098_v56 = vadd.f32 %v3731_v60, %v897_v8  ;;  %v2058_v18 = vpop.f32.mrb[32].mxu1  ;;  %1737 = vst [vmem:[#allocation15 + $0xd0] sm:$0xff] %v1673_v27  ;;  %v1611_v0 = vmul.f32 %v3734_v44, %v1159_v17 }
 0x1b9   :  { %v1097_v58 = vadd.f32 %v3731_v60, %v892_v13  ;;  %v2186_v14 = vpop.f32.mrb[32].mxu0  ;;  %v516_v29 = vpop.f32.mrb[33].mxu1  ;;  %v1676_v46 = vadd.f32 %v1612_v7, %v4074_v55 }
 0x1ba   :  { %v1162_v37 = vmax.f32 %v1098_v56, 0.0  ;;  %v907_v33 = vadd.f32 %v2186_v14, %v2058_v18  ;;  %v901_v62 = vpop.f32.mrb[33].mxu0  ;;  %v1675_v61 = vadd.f32 %v1611_v0, %v4075_v53 }
 0x1bb   :  { %v1161_v6 = vmax.f32 %v1097_v58, 0.0  ;;  %v902_v38 = vadd.f32 %v901_v62, %v516_v29  ;;  %1740 = vst [vmem:[#allocation15 + $0xe8] sm:$0xff] %v1676_v46 }
 0x1bc   :  { %v1614_v4 = vmul.f32 %v3734_v44, %v1162_v37  ;;  %v1100_v31 = vadd.f32 %v3731_v60, %v907_v33  ;;  %1739 = vst [vmem:[#allocation15 + $0xe0] sm:$0xff] %v1675_v61 }
 0x1bd   :  { %v2061_v25 = vpop.f32.mrb[34].mxu1  ;;  %v1613_v11 = vmul.f32 %v3734_v44, %v1161_v6  ;;  %v1099_v21 = vadd.f32 %v3731_v60, %v902_v38 }
 0x1be   :  { %v2189_v54 = vpop.f32.mrb[34].mxu0  ;;  %v526_v39 = vpop.f32.mrb[35].mxu1  ;;  %v1678_v3 = vadd.f32 %v1614_v4, %v4076_v43  ;;  %v1164_v35 = vmax.f32 %v1100_v31, 0.0 }
 0x1bf   :  { %v917_v15 = vadd.f32 %v2189_v54, %v2061_v25  ;;  %v911_v10 = vpop.f32.mrb[35].mxu0  ;;  %v1677_v45 = vadd.f32 %v1613_v11, %v4077_v19  ;;  %v1163_v59 = vmax.f32 %v1099_v21, 0.0 }
 0x1c0   :  { %v912_v2 = vadd.f32 %v911_v10, %v526_v39  ;;  %1742 = vst [vmem:[#allocation15 + $0xf8] sm:$0xff] %v1678_v3  ;;  %v1616_v23 = vmul.f32 %v3734_v44, %v1164_v35 }
 0x1c1   :  { %v1102_v20 = vadd.f32 %v3731_v60, %v917_v15  ;;  %v2064_v1 = vpop.f32.mrb[36].mxu1  ;;  %1741 = vst [vmem:[#allocation15 + $0xf0] sm:$0xff] %v1677_v45  ;;  %v1615_v51 = vmul.f32 %v3734_v44, %v1163_v59 }
 0x1c2   :  { %v1101_v30 = vadd.f32 %v3731_v60, %v912_v2  ;;  %v2192_v36 = vpop.f32.mrb[36].mxu0  ;;  %v536_v22 = vpop.f32.mrb[37].mxu1  ;;  %v1680_v32 = vadd.f32 %v1616_v23, %v4078_v9 }
 0x1c3   :  { %v1166_v26 = vmax.f32 %v1102_v20, 0.0  ;;  %v927_v52 = vadd.f32 %v2192_v36, %v2064_v1  ;;  %v921_v57 = vpop.f32.mrb[37].mxu0 }
 0x1c4   :  { %2524 = shalt.err (!%p2521_p13)
}
 0x1c5   :  { %s2525_s10 = scalar_lea.hbm %s3972_s8, 4096 }
 0x1c6   :  { %p2526_p0 = scmp.ne.s32.totalorder %s3972_s8, %s2525_s10  ;;  %p2529_p1 = scmp.lt.u32.totalorder %s2525_s10, %s3972_s8 }
 0x1c8   :  { %p2531_p2 = pnand %p2529_p1, %p2526_p0 }
 0x1ca   :  { %2534 = shalt.err (!%p2531_p2)
}
 0x1cb   :  { %1786 = dma.vmem_to_hbm [thread:$0]  %s3833_s30, 4096, %s3972_s8, [#allocation4], %s2573_s21, %s2573_s21, %s2574_s22   ;;  %v4079_v47 = vld [vmem:[#allocation57_spill] sm:$0xff]  ;;  %v1165_v41 = vmax.f32 %v1101_v30, 0.0  ;;  %v922_v48 = vadd.f32 %v921_v57, %v536_v22  ;;  %1744 = vst [vmem:[#allocation16 + $0x8] sm:$0xff] %v1680_v32  ;;  %v1618_v28 = vmul.f32 %v3734_v44, %v1166_v26  ;;  %v1104_v12 = vadd.f32 %v3731_v60, %v927_v52  ;;  %v2067_v16 = vpop.f32.mrb[38].mxu1 }
 0x1cc   :  { %v1679_v49 = vadd.f32 %v1615_v51, %v4079_v47  ;;  %v2195_v5 = vpop.f32.mrb[38].mxu0  ;;  %v546_v63 = vpop.f32.mrb[39].mxu1  ;;  %v4080_v27 = vld [vmem:[#allocation60_spill] sm:$0xff]  ;;  %v4081_v18 = vld [vmem:[#allocation59_spill] sm:$0xff]  ;;  %v4082_v61 = vld [vmem:[#allocation62_spill] sm:$0xff]  ;;  %s2581_s8 = smov [#allocation16]  }
 0x1cd   :  { %v1617_v42 = vmul.f32 %v3734_v44, %v1165_v41  ;;  %v1103_v8 = vadd.f32 %v3731_v60, %v922_v48  ;;  %v1682_v17 = vadd.f32 %v1618_v28, %v4080_v27  ;;  %v1168_v13 = vmax.f32 %v1104_v12, 0.0  ;;  %v931_v56 = vpop.f32.mrb[39].mxu0  ;;  %v2070_v46 = vpop.f32.mrb[40].mxu1  ;;  %v4083_v25 = vld [vmem:[#allocation61_spill] sm:$0xff]  ;;  %v4084_v45 = vld [vmem:[#allocation64_spill] sm:$0xff]  ;;  %v4085_v1 = vld [vmem:[#allocation63_spill] sm:$0xff] }
 0x1ce   :  { %1743 = vst [vmem:[#allocation16] sm:$0xff] %v1679_v49  ;;  %v937_v7 = vadd.f32 %v2195_v5, %v2067_v16  ;;  %v932_v14 = vadd.f32 %v931_v56, %v546_v63  ;;  %v2198_v62 = vpop.f32.mrb[40].mxu0  ;;  %v556_v53 = vpop.f32.mrb[41].mxu1  ;;  %v4086_v49 = vld [vmem:[#allocation66_spill] sm:$0xff]  ;;  %v4087_v16 = vld [vmem:[#allocation65_spill] sm:$0xff]  ;;  %s1792_s17 = sshll.u32 %s2581_s8, 4  ;;  %s1793_s17 = int_to_ptr.vmem [resolvable:$true] %s1792_s17 }
 0x1cf   :  { %v1681_v0 = vadd.f32 %v1617_v42, %v4081_v18  ;;  %v1167_v58 = vmax.f32 %v1103_v8, 0.0  ;;  %1746 = vst [vmem:[#allocation16 + $0x18] sm:$0xff] %v1682_v17  ;;  %v1620_v29 = vmul.f32 %v3734_v44, %v1168_v13  ;;  %v947_v4 = vadd.f32 %v2198_v62, %v2070_v46  ;;  %v941_v31 = vpop.f32.mrb[41].mxu0  ;;  %v2073_v3 = vpop.f32.mrb[42].mxu1  ;;  %v4089_v46 = vld [vmem:[#allocation67_spill] sm:$0xff]  ;;  %s2535_s18 = scalar_lea.vmem %s1793_s17, 4096  ;;  %p2540_p4 = scmp.lt.s32.totalorder %s1793_s17, %s1793_s17 }
 0x1d0   :  { %v1106_v55 = vadd.f32 %v3731_v60, %v937_v7  ;;  %v1105_v33 = vadd.f32 %v3731_v60, %v932_v14  ;;  %v942_v54 = vadd.f32 %v941_v31, %v556_v53  ;;  %v2201_v10 = vpop.f32.mrb[42].mxu0  ;;  %v566_v19 = vpop.f32.mrb[43].mxu1  ;;  %p2536_p3 = scmp.ne.s32.totalorder %s1793_s17, %s2535_s18  ;;  %p2541_p5 = scmp.lt.s32.totalorder %s2535_s18, %s2535_s18 }
 0x1d1   :  { %1745 = vst [vmem:[#allocation16 + $0x10] sm:$0xff] %v1681_v0  ;;  %v1619_v37 = vmul.f32 %v3734_v44, %v1167_v58  ;;  %v1684_v6 = vadd.f32 %v1620_v29, %v4082_v61  ;;  %v1108_v43 = vadd.f32 %v3731_v60, %v947_v4  ;;  %v957_v23 = vadd.f32 %v2201_v10, %v2073_v3  ;;  %v951_v20 = vpop.f32.mrb[43].mxu0  ;;  %v4088_v0 = vld [vmem:[#allocation68_spill] sm:$0xff]  ;;  %v4091_v3 = vld [vmem:[#allocation69_spill] sm:$0xff] }
 0x1d2   :  { %v1170_v38 = vmax.f32 %v1106_v55, 0.0  ;;  %v1169_v21 = vmax.f32 %v1105_v33, 0.0  ;;  %v1107_v15 = vadd.f32 %v3731_v60, %v942_v54  ;;  %v952_v36 = vadd.f32 %v951_v20, %v566_v19  ;;  %v2076_v32 = vpop.f32.mrb[44].mxu1  ;;  %p2542_p6 = por %p2541_p5, %p2540_p4 }
 0x1d3   :  { %v1683_v11 = vadd.f32 %v1619_v37, %v4083_v25  ;;  %1748 = vst [vmem:[#allocation16 + $0x28] sm:$0xff] %v1684_v6  ;;  %v1172_v2 = vmax.f32 %v1108_v43, 0.0  ;;  %v1110_v9 = vadd.f32 %v3731_v60, %v957_v23  ;;  %v2204_v57 = vpop.f32.mrb[44].mxu0  ;;  %v576_v47 = vpop.f32.mrb[45].mxu1 }
 0x1d4   :  { %v1622_v39 = vmul.f32 %v3734_v44, %v1170_v38  ;;  %v1621_v35 = vmul.f32 %v3734_v44, %v1169_v21  ;;  %v1171_v30 = vmax.f32 %v1107_v15, 0.0  ;;  %v1109_v52 = vadd.f32 %v3731_v60, %v952_v36  ;;  %v961_v12 = vpop.f32.mrb[45].mxu0  ;;  %p2543_p7 = pnand %p2542_p6, %p2536_p3 }
 0x1d5   :  { %1747 = vst [vmem:[#allocation16 + $0x20] sm:$0xff] %v1683_v11  ;;  %v1624_v22 = vmul.f32 %v3734_v44, %v1172_v2  ;;  %v1174_v48 = vmax.f32 %v1110_v9, 0.0  ;;  %v967_v28 = vadd.f32 %v2204_v57, %v2076_v32  ;;  %v962_v5 = vadd.f32 %v961_v12, %v576_v47  ;;  %v4090_v11 = vld [vmem:[#allocation70_spill] sm:$0xff]  ;;  %v4093_v32 = vld [vmem:[#allocation71_spill] sm:$0xff] }
 0x1d6   :  { %v1686_v59 = vadd.f32 %v1622_v39, %v4084_v45  ;;  %v1685_v51 = vadd.f32 %v1621_v35, %v4085_v1  ;;  %v1623_v26 = vmul.f32 %v3734_v44, %v1171_v30  ;;  %v1173_v8 = vmax.f32 %v1109_v52, 0.0  ;;  %v2079_v17 = vpop.f32.mrb[46].mxu1 }
 0x1d7   :  { %v1688_v41 = vadd.f32 %v1624_v22, %v4086_v49  ;;  %v1626_v63 = vmul.f32 %v3734_v44, %v1174_v48  ;;  %v1112_v27 = vadd.f32 %v3731_v60, %v967_v28  ;;  %v1111_v7 = vadd.f32 %v3731_v60, %v962_v5  ;;  %v2207_v56 = vpop.f32.mrb[46].mxu0  ;;  %v586_v18 = vpop.f32.mrb[47].mxu1 }
 0x1d8   :  { %1750 = vst [vmem:[#allocation16 + $0x38] sm:$0xff] %v1686_v59  ;;  %1749 = vst [vmem:[#allocation16 + $0x30] sm:$0xff] %v1685_v51  ;;  %v1687_v42 = vadd.f32 %v1623_v26, %v4087_v16  ;;  %v1625_v13 = vmul.f32 %v3734_v44, %v1173_v8  ;;  %v977_v29 = vadd.f32 %v2207_v56, %v2079_v17  ;;  %v971_v55 = vpop.f32.mrb[47].mxu0  ;;  %v4092_v51 = vld [vmem:[#allocation72_spill] sm:$0xff]  ;;  %v4095_v17 = vld [vmem:[#allocation73_spill] sm:$0xff] }
 0x1d9   :  { %1752 = vst [vmem:[#allocation16 + $0x48] sm:$0xff] %v1688_v41  ;;  %v1690_v58 = vadd.f32 %v1626_v63, %v4088_v0  ;;  %v1176_v14 = vmax.f32 %v1112_v27, 0.0  ;;  %v1175_v33 = vmax.f32 %v1111_v7, 0.0  ;;  %v972_v62 = vadd.f32 %v971_v55, %v586_v18 }
 0x1da   :  { %1751 = vst [vmem:[#allocation16 + $0x40] sm:$0xff] %v1687_v42  ;;  %v1689_v37 = vadd.f32 %v1625_v13, %v4089_v46  ;;  %v1114_v61 = vadd.f32 %v3731_v60, %v977_v29  ;;  %v2082_v6 = vpop.f32.mrb[48].mxu1  ;;  %v4094_v42 = vld [vmem:[#allocation74_spill] sm:$0xff] }
 0x1db   :  { %1754 = vst [vmem:[#allocation16 + $0x58] sm:$0xff] %v1690_v58  ;;  %v1628_v53 = vmul.f32 %v3734_v44, %v1176_v14  ;;  %v1627_v38 = vmul.f32 %v3734_v44, %v1175_v33  ;;  %v1113_v4 = vadd.f32 %v3731_v60, %v972_v62  ;;  %v2210_v31 = vpop.f32.mrb[48].mxu0  ;;  %v596_v25 = vpop.f32.mrb[49].mxu1 }
 0x1dc   :  { %1753 = vst [vmem:[#allocation16 + $0x50] sm:$0xff] %v1689_v37  ;;  %v1178_v54 = vmax.f32 %v1114_v61, 0.0  ;;  %v987_v39 = vadd.f32 %v2210_v31, %v2082_v6  ;;  %v981_v43 = vpop.f32.mrb[49].mxu0  ;;  %v4096_v37 = vld [vmem:[#allocation76_spill] sm:$0xff]  ;;  %v4097_v6 = vld [vmem:[#allocation75_spill] sm:$0xff] }
 0x1dd   :  { %v1692_v21 = vadd.f32 %v1628_v53, %v4090_v11  ;;  %v1691_v35 = vadd.f32 %v1627_v38, %v4091_v3  ;;  %v1177_v15 = vmax.f32 %v1113_v4, 0.0  ;;  %v982_v10 = vadd.f32 %v981_v43, %v596_v25 }
 0x1de   :  { %v1630_v19 = vmul.f32 %v3734_v44, %v1178_v54  ;;  %v1116_v45 = vadd.f32 %v3731_v60, %v987_v39  ;;  %v2085_v59 = vpop.f32.mrb[50].mxu1 }
 0x1df   :  { %1756 = vst [vmem:[#allocation16 + $0x68] sm:$0xff] %v1692_v21  ;;  %1755 = vst [vmem:[#allocation16 + $0x60] sm:$0xff] %v1691_v35  ;;  %v1629_v2 = vmul.f32 %v3734_v44, %v1177_v15  ;;  %v1115_v23 = vadd.f32 %v3731_v60, %v982_v10  ;;  %v2213_v20 = vpop.f32.mrb[50].mxu0  ;;  %v606_v1 = vpop.f32.mrb[51].mxu1  ;;  %v4098_v35 = vld [vmem:[#allocation79_spill] sm:$0xff] }
 0x1e0   :  { %v1694_v30 = vadd.f32 %v1630_v19, %v4092_v51  ;;  %v1180_v36 = vmax.f32 %v1116_v45, 0.0  ;;  %v997_v22 = vadd.f32 %v2213_v20, %v2085_v59  ;;  %v991_v9 = vpop.f32.mrb[51].mxu0  ;;  %v4099_v59 = vld [vmem:[#allocation77_spill] sm:$0xff] }
 0x1e1   :  { %v1693_v26 = vadd.f32 %v1629_v2, %v4093_v32  ;;  %v1179_v52 = vmax.f32 %v1115_v23, 0.0  ;;  %v992_v57 = vadd.f32 %v991_v9, %v606_v1 }
 0x1e2   :  { %1758 = vst [vmem:[#allocation16 + $0x78] sm:$0xff] %v1694_v30  ;;  %v1632_v47 = vmul.f32 %v3734_v44, %v1180_v36  ;;  %v1118_v49 = vadd.f32 %v3731_v60, %v997_v22  ;;  %v2088_v41 = vpop.f32.mrb[52].mxu1 }
 0x1e3   :  { %1757 = vst [vmem:[#allocation16 + $0x70] sm:$0xff] %v1693_v26  ;;  %v1631_v48 = vmul.f32 %v3734_v44, %v1179_v52  ;;  %v1117_v28 = vadd.f32 %v3731_v60, %v992_v57  ;;  %v2216_v12 = vpop.f32.mrb[52].mxu0  ;;  %v616_v16 = vpop.f32.mrb[53].mxu1  ;;  %v4100_v26 = vld [vmem:[#allocation81_spill] sm:$0xff] }
 0x1e4   :  { %v1696_v8 = vadd.f32 %v1632_v47, %v4094_v42  ;;  %v1182_v5 = vmax.f32 %v1118_v49, 0.0  ;;  %v1007_v63 = vadd.f32 %v2216_v12, %v2088_v41  ;;  %v1001_v27 = vpop.f32.mrb[53].mxu0  ;;  %v4101_v41 = vld [vmem:[#allocation80_spill] sm:$0xff] }
 0x1e5   :  { %v1695_v13 = vadd.f32 %v1631_v48, %v4095_v17  ;;  %v1181_v7 = vmax.f32 %v1117_v28, 0.0  ;;  %v1002_v56 = vadd.f32 %v1001_v27, %v616_v16 }
 0x1e6   :  { %1760 = vst [vmem:[#allocation16 + $0x88] sm:$0xff] %v1696_v8  ;;  %v1634_v18 = vmul.f32 %v3734_v44, %v1182_v5  ;;  %v1120_v0 = vadd.f32 %v3731_v60, %v1007_v63  ;;  %v2091_v58 = vpop.f32.mrb[54].mxu1 }
 0x1e7   :  { %1759 = vst [vmem:[#allocation16 + $0x80] sm:$0xff] %v1695_v13  ;;  %v1633_v14 = vmul.f32 %v3734_v44, %v1181_v7  ;;  %v1119_v29 = vadd.f32 %v3731_v60, %v1002_v56  ;;  %v2219_v55 = vpop.f32.mrb[54].mxu0  ;;  %v626_v46 = vpop.f32.mrb[55].mxu1  ;;  %v4102_v13 = vld [vmem:[#allocation84_spill] sm:$0xff] }
 0x1e8   :  { %v1698_v33 = vadd.f32 %v1634_v18, %v4096_v37  ;;  %v1184_v62 = vmax.f32 %v1120_v0, 0.0  ;;  %v1017_v53 = vadd.f32 %v2219_v55, %v2091_v58  ;;  %v1011_v61 = vpop.f32.mrb[55].mxu0  ;;  %v4103_v58 = vld [vmem:[#allocation82_spill] sm:$0xff] }
 0x1e9   :  { %v1697_v38 = vadd.f32 %v1633_v14, %v4097_v6  ;;  %v1183_v4 = vmax.f32 %v1119_v29, 0.0  ;;  %v1012_v31 = vadd.f32 %v1011_v61, %v626_v46 }
 0x1ea   :  { %1762 = vst [vmem:[#allocation16 + $0x98] sm:$0xff] %v1698_v33  ;;  %v1636_v25 = vmul.f32 %v3734_v44, %v1184_v62  ;;  %v1122_v11 = vadd.f32 %v3731_v60, %v1017_v53  ;;  %v2094_v21 = vpop.f32.mrb[56].mxu1 }
 0x1eb   :  { %1761 = vst [vmem:[#allocation16 + $0x90] sm:$0xff] %v1697_v38  ;;  %v1635_v54 = vmul.f32 %v3734_v44, %v1183_v4  ;;  %v1121_v39 = vadd.f32 %v3731_v60, %v1012_v31  ;;  %v2222_v43 = vpop.f32.mrb[56].mxu0  ;;  %v636_v3 = vpop.f32.mrb[57].mxu1  ;;  %v4104_v38 = vld [vmem:[#allocation88_spill] sm:$0xff] }
 0x1ec   :  { %v1700_v15 = vadd.f32 %v1636_v25, %v4098_v35  ;;  %v1186_v10 = vmax.f32 %v1122_v11, 0.0  ;;  %v1027_v19 = vadd.f32 %v2222_v43, %v2094_v21  ;;  %v1021_v45 = vpop.f32.mrb[57].mxu0  ;;  %v4105_v21 = vld [vmem:[#allocation87_spill] sm:$0xff] }
 0x1ed   :  { %v1699_v2 = vadd.f32 %v1635_v54, %v4099_v59  ;;  %v1185_v23 = vmax.f32 %v1121_v39, 0.0  ;;  %v1022_v20 = vadd.f32 %v1021_v45, %v636_v3 }
 0x1ee   :  { %1764 = vst [vmem:[#allocation16 + $0xa8] sm:$0xff] %v1700_v15  ;;  %v1638_v1 = vmul.f32 %v3734_v44, %v1186_v10  ;;  %v1124_v51 = vadd.f32 %v3731_v60, %v1027_v19  ;;  %v2097_v30 = vpop.f32.mrb[58].mxu1 }
 0x1ef   :  { %1763 = vst [vmem:[#allocation16 + $0xa0] sm:$0xff] %v1699_v2  ;;  %v1637_v36 = vmul.f32 %v3734_v44, %v1185_v23  ;;  %v1123_v22 = vadd.f32 %v3731_v60, %v1022_v20  ;;  %v2225_v9 = vpop.f32.mrb[58].mxu0  ;;  %v646_v32 = vpop.f32.mrb[59].mxu1 }
 0x1f0   :  { %v1702_v52 = vadd.f32 %v1638_v1, %v4100_v26  ;;  %v1188_v57 = vmax.f32 %v1124_v51, 0.0  ;;  %v1037_v47 = vadd.f32 %v2225_v9, %v2097_v30  ;;  %v1031_v49 = vpop.f32.mrb[59].mxu0 }
 0x1f1   :  { %v1701_v48 = vadd.f32 %v1637_v36, %v4101_v41  ;;  %v1187_v28 = vmax.f32 %v1123_v22, 0.0  ;;  %v1032_v12 = vadd.f32 %v1031_v49, %v646_v32 }
 0x1f2   :  { %1766 = vst [vmem:[#allocation16 + $0xb8] sm:$0xff] %v1702_v52  ;;  %v1640_v16 = vmul.f32 %v3734_v44, %v1188_v57  ;;  %v1126_v42 = vadd.f32 %v3731_v60, %v1037_v47  ;;  %v2100_v8 = vpop.f32.mrb[60].mxu1 }
 0x1f3   :  { %1765 = vst [vmem:[#allocation16 + $0xb0] sm:$0xff] %v1701_v48  ;;  %v1639_v5 = vmul.f32 %v3734_v44, %v1187_v28  ;;  %v1125_v63 = vadd.f32 %v3731_v60, %v1032_v12  ;;  %v2228_v27 = vpop.f32.mrb[60].mxu0  ;;  %v656_v17 = vpop.f32.mrb[61].mxu1 }
 0x1f4   :  { %v1704_v7 = vadd.f32 %v1640_v16, %v4102_v13  ;;  %v1190_v56 = vmax.f32 %v1126_v42, 0.0  ;;  %v1047_v18 = vadd.f32 %v2228_v27, %v2100_v8  ;;  %v1041_v0 = vpop.f32.mrb[61].mxu0 }
 0x1f5   :  { %v1703_v14 = vadd.f32 %v1639_v5, %v4103_v58  ;;  %v1189_v29 = vmax.f32 %v1125_v63, 0.0  ;;  %v1042_v55 = vadd.f32 %v1041_v0, %v656_v17 }
 0x1f6   :  { %1768 = vst [vmem:[#allocation16 + $0xc8] sm:$0xff] %v1704_v7  ;;  %v1642_v46 = vmul.f32 %v3734_v44, %v1190_v56  ;;  %v1128_v37 = vadd.f32 %v3731_v60, %v1047_v18  ;;  %v2103_v33 = vpop.f32.mrb[62].mxu1 }
 0x1f7   :  { %1767 = vst [vmem:[#allocation16 + $0xc0] sm:$0xff] %v1703_v14  ;;  %v1641_v62 = vmul.f32 %v3734_v44, %v1189_v29  ;;  %v1127_v53 = vadd.f32 %v3731_v60, %v1042_v55  ;;  %v2231_v61 = vpop.f32.mrb[62].mxu0  ;;  %v666_v6 = vpop.f32.mrb[63].mxu1 }
 0x1f8   :  { %v1706_v4 = vadd.f32 %v1642_v46, %v4104_v38  ;;  %v1192_v31 = vmax.f32 %v1128_v37, 0.0  ;;  %v1057_v25 = vadd.f32 %v2231_v61, %v2103_v33  ;;  %v1051_v11 = vpop.f32.mrb[63].mxu0 }
 0x1f9   :  { %v1705_v54 = vadd.f32 %v1641_v62, %v4105_v21  ;;  %v1191_v39 = vmax.f32 %v1127_v53, 0.0  ;;  %v1052_v43 = vadd.f32 %v1051_v11, %v666_v6 }
 0x1fa   :  { %1770 = vst [vmem:[#allocation16 + $0xd8] sm:$0xff] %v1706_v4  ;;  %v1644_v3 = vmul.f32 %v3734_v44, %v1192_v31  ;;  %v1130_v35 = vadd.f32 %v3731_v60, %v1057_v25 }
 0x1fb   :  { %1769 = vst [vmem:[#allocation16 + $0xd0] sm:$0xff] %v1705_v54  ;;  %v1643_v15 = vmul.f32 %v3734_v44, %v1191_v39  ;;  %v1129_v10 = vadd.f32 %v3731_v60, %v1052_v43 }
 0x1fc   :  { %v1708_v19 = vadd.f32 %v1644_v3, %v3677_v24  ;;  %v1194_v45 = vmax.f32 %v1130_v35, 0.0 }
 0x1fd   :  { %v1707_v59 = vadd.f32 %v1643_v15, %v3668_v40  ;;  %v1193_v2 = vmax.f32 %v1129_v10, 0.0 }
 0x1fe   :  { %1772 = vst [vmem:[#allocation16 + $0xe8] sm:$0xff] %v1708_v19  ;;  %v1646_v23 = vmul.f32 %v3734_v44, %v1194_v45 }
 0x1ff   :  { %1771 = vst [vmem:[#allocation16 + $0xe0] sm:$0xff] %v1707_v59  ;;  %v1645_v20 = vmul.f32 %v3734_v44, %v1193_v2 }
 0x200   :  { %v1710_v1 = vadd.f32 %v1646_v23, %v3685_v34 }
 0x201   :  { %v1709_v51 = vadd.f32 %v1645_v20, %v3679_v50 }
 0x202   :  { %1774 = vst [vmem:[#allocation16 + $0xf8] sm:$0xff] %v1710_v1 }
 0x203   :  { %1773 = vst [vmem:[#allocation16 + $0xf0] sm:$0xff] %v1709_v51 }
 0x204   :  { %2546 = shalt.err (!%p2543_p7)
}
 0x205   :  { %s2547_s23 = scalar_lea.hbm %s3973_s9, 4096 }
 0x206   :  { %p2548_p8 = scmp.ne.s32.totalorder %s3973_s9, %s2547_s23  ;;  %p2551_p9 = scmp.lt.u32.totalorder %s2547_s23, %s3973_s9 }
 0x208   :  { %p2553_p10 = pnand %p2551_p9, %p2548_p8 }
 0x20a   :  { %2556 = shalt.err (!%p2553_p10)
}
 0x20b   :  { %1798 = dma.vmem_to_hbm [thread:$0]  %s1793_s17, 4096, %s3973_s9, [#allocation17], %s2573_s21, %s2573_s21, %s2574_s22  }
 0x20c   :  { %2567 = dma.done.wait [#allocation4], 4096  }
 0x20d   :  { %2568 = vsyncadd [#allocation4], 4294963200 }
 0x20e   :  { %2569 = dma.done.wait [#allocation17], 4096  }
 0x20f   :  { %2570 = vsyncadd [#allocation17], 4294963200 }
 0x210   :  { %1805 = vsyncpa [#allocation3], 1 }
 0x211   :  { %1806 = vsyncpa [#allocation8], 1 }
 0x212   :  { %1807 = vsyncpa [#allocation11], 1 }
 0x213   :  { %1808 = vsyncpa [#allocation14], 1 }
 0x214   :  { %1809 = vsyncpa [#allocation4], 1 }
 0x215   :  { %1810 = vsyncpa [#allocation17], 1 }
 0x216   :  { %1811 = vsyncpa [#allocation5], 1 }

</bundles_post_ra>
